<compile_context>
chip_gen: v7x
topology: tpu7x:2x2x1
jax: 0.10.0
libtpu: 0.0.40
codegen_flags: <defaults>
</compile_context>

<pallas_src>
import functools

import jax
import jax.numpy as jnp
from jax.experimental import pallas as pl
from jax.experimental.pallas import tpu as pltpu

LANES = 128  # batch rows packed per output lane-row (output width is 1)


def fused_mlp_kernel(y_ref, w_ref, bf_ref, o_ref):
    # y_ref : (RT, 128*D_in) VMEM -- 128 batch rows packed per Y-row (lane-dense)
    # w_ref : (128*D_in, 128) VMEM -- block-diagonal fused weight (same block every
    #                                 step -> pinned, DMA'd once)
    # bf_ref: (1, 1)          SMEM -- fused scalar bias (b1 @ W2 + b2)
    # o_ref : (RT, 128)       VMEM -- lane-dense output, batch on the lane axis
    acc = jnp.dot(y_ref[...], w_ref[...], preferred_element_type=jnp.float32)
    o_ref[...] = jax.nn.sigmoid(acc + bf_ref[0, 0])  # EUP transcendental


@functools.partial(jax.jit, static_argnames=("block_rows",))
def mlp_forward(x, w1, b1, w2, b2, *, block_rows=256):
    """sigmoid((x @ w1 + b1) @ w2 + b2) with both affine layers fused."""
    B, D_in = x.shape
    K = LANES * D_in  # contraction width of the packed matmul (4096 for D_in=32)

    # --- algebraic fusion (tiny; fused into this jit, no extra dispatches) ---
    hp = jax.lax.Precision.HIGHEST
    wf = jnp.dot(w1, w2, precision=hp).reshape(D_in)                  # (D_in,)
    bf = (jnp.dot(b1, w2, precision=hp) + b2).reshape(1, 1).astype(jnp.float32)

    # Block-diagonal expansion: Wb[d*D_in + k, j] = wf[k] if d == j else 0.
    # 2 MiB f32 for D_in=32 -> lives in VMEM for the whole call.
    # (Assumes modest D_in; for very large D_in a plain two-stage matmul is better.)
    eye = jnp.eye(LANES, dtype=jnp.float32)
    wb = (eye[:, None, :] * wf.astype(jnp.float32)[None, :, None]).reshape(K, LANES)

    # Pad batch to a multiple of 128 so (B, D_in) reshapes *for free* to
    # (B/128, 128*D_in).  No-op when B % 128 == 0 (the common large-batch case).
    Bp = ((B + LANES - 1) // LANES) * LANES
    xp = x if Bp == B else jnp.pad(x, ((0, Bp - B), (0, 0)))
    rows = Bp // LANES
    y = xp.reshape(rows, K).astype(jnp.float32)

    # Batch tile: block_rows Y-rows = block_rows*128 batch rows per grid step.
    rt = min(block_rows, rows)
    if rt < rows:
        rt = max(8, (rt // 8) * 8)  # keep sublane-aligned when not the full dim
    grid = (pl.cdiv(rows, rt),)

    out = pl.pallas_call(
        fused_mlp_kernel,
        out_shape=jax.ShapeDtypeStruct((rows, LANES), jnp.float32),
        grid_spec=pltpu.PrefetchScalarGridSpec(
            num_scalar_prefetch=0,
            grid=grid,
            in_specs=[
                # Packed activations: tile over Y-rows.
                pl.BlockSpec((rt, K), lambda i: (i, 0)),
                # Fused weight: same block every step (no re-DMA).
                pl.BlockSpec((K, LANES), lambda i: (0, 0)),
                # Fused scalar bias in SMEM.
                pl.BlockSpec(memory_space=pltpu.MemorySpace.SMEM),
            ],
            out_specs=pl.BlockSpec((rt, LANES), lambda i: (i, 0)),
        ),
        compiler_params=pltpu.CompilerParams(
            dimension_semantics=("parallel",),       # independent batch tiles
            vmem_limit_bytes=32 * 1024 * 1024,       # covers v5e's lower default
        ),
    )(y, wb, bf)

    # (rows, 128) row-major == batch order; slice off pad rows (tiny copy).
    return out.reshape(Bp, 1)[:B]


def init_linear_params(key, fan_in, fan_out):
    # Mimic PyTorch nn.Linear default init: U(-1/sqrt(fan_in), 1/sqrt(fan_in)).
    kw, kb = jax.random.split(key)
    bound = 1.0 / jnp.sqrt(jnp.float32(fan_in))
    w = jax.random.uniform(kw, (fan_in, fan_out), jnp.float32, -bound, bound)
    b = jax.random.uniform(kb, (1, fan_out), jnp.float32, -bound, bound)
    return w, b


if __name__ == "__main__":
    key = jax.random.PRNGKey(0)
    k_x, k_l1, k_l2 = jax.random.split(key, 3)

    batch = 8
    n_input = 32   # Number_Input_Neurons (len(X[0]))
    hidden = 128

    x = jax.random.normal(k_x, (batch, n_input), jnp.float32)
    w1, b1 = init_linear_params(k_l1, n_input, hidden)
    w2, b2 = init_linear_params(k_l2, hidden, 1)

    out = mlp_forward(x, w1, b1, w2, b2)
    out = jax.block_until_ready(out)

    # Pure-JAX reference (unfused, exactly the PyTorch forward semantics).
    h = jnp.dot(x, w1, precision=jax.lax.Precision.HIGHEST) + b1
    ref = jax.nn.sigmoid(jnp.dot(h, w2, precision=jax.lax.Precision.HIGHEST) + b2)

    assert out.shape == (batch, 1)
    err = float(jnp.max(jnp.abs(out - ref)))
    assert err < 1e-3, f"max abs err {err}"

    print("KERNEL_OK")
</pallas_src>

<mosaic_0001>
module attributes {stable_mosaic.version = 11 : i64} {
  func.func @fused_mlp_kernel(%arg0: i32, %arg1: memref<1x4096xf32, #tpu.memory_space<vmem>>, %arg2: memref<4096x128xf32, #tpu.memory_space<vmem>>, %arg3: memref<1x1xf32, #tpu.memory_space<smem>>, %arg4: memref<1x128xf32, #tpu.memory_space<vmem>>) attributes {dimension_semantics = [#tpu.dimension_semantics<parallel>], iteration_bounds = array<i64: 1>, scalar_prefetch = 0 : i64, scratch_operands = 0 : i64, tpu.core_type = #tpu.core_type<tc>, window_params = [{transform_indices = @transform_0, window_bounds = array<i64: 1, 4096>}, {pipeline_mode = #tpu.pipeline_mode<synchronous>, transform_indices = @transform_1, window_bounds = array<i64: 4096, 128>}, {transform_indices = @transform_2, window_bounds = array<i64: 1, 1>}, {transform_indices = @transform_3, window_bounds = array<i64: 1, 128>}]} {
    %c0 = arith.constant 0 : index
    %c0_0 = arith.constant 0 : index
    %0 = vector.load %arg1[%c0, %c0_0] : memref<1x4096xf32, #tpu.memory_space<vmem>>, vector<1x4096xf32>
    %c0_1 = arith.constant 0 : index
    %c0_2 = arith.constant 0 : index
    %1 = vector.load %arg2[%c0_1, %c0_2] : memref<4096x128xf32, #tpu.memory_space<vmem>>, vector<4096x128xf32>
    %cst = arith.constant dense<0.000000e+00> : vector<1x128xf32>
    %2 = tpu.matmul %0, %1, %cst {dimension_numbers = #tpu.dot_dimension_numbers<[1], [0], [0], [1], [0, 0, 1, 1], [], []>} : vector<1x4096xf32>, vector<4096x128xf32>, vector<1x128xf32> -> vector<1x128xf32>
    %c0_3 = arith.constant 0 : index
    %c0_4 = arith.constant 0 : index
    %3 = memref.load %arg3[%c0_3, %c0_4] : memref<1x1xf32, #tpu.memory_space<smem>>
    %4 = vector.broadcast %3 : f32 to vector<1x128xf32>
    %5 = arith.addf %2, %4 : vector<1x128xf32>
    %6 = arith.negf %5 : vector<1x128xf32>
    %7 = math.exp %6 : vector<1x128xf32>
    %cst_5 = arith.constant 1.000000e+00 : f32
    %8 = vector.broadcast %cst_5 : f32 to vector<1x128xf32>
    %9 = arith.addf %8, %7 : vector<1x128xf32>
    %10 = arith.divf %8, %9 : vector<1x128xf32>
    %c0_6 = arith.constant 0 : index
    %c0_7 = arith.constant 0 : index
    %11 = vector.load %arg4[%c0_6, %c0_7] : memref<1x128xf32, #tpu.memory_space<vmem>>, vector<1x128xf32>
    tpu.vector_store %arg4[%c0_6, %c0_7], %10 {strides = array<i32>} : memref<1x128xf32, #tpu.memory_space<vmem>>, vector<1x128xf32>,
    return
  }
  func.func @transform_0(%arg0: i32) -> (i32, i32) {
    %c0_i32 = arith.constant 0 : i32
    %c0_i32_0 = arith.constant 0 : i32
    return %arg0, %c0_i32 : i32, i32
  }
  func.func @transform_1(%arg0: i32) -> (i32, i32) {
    %c0_i32 = arith.constant 0 : i32
    %c0_i32_0 = arith.constant 0 : i32
    %c0_i32_1 = arith.constant 0 : i32
    return %c0_i32, %c0_i32_0 : i32, i32
  }
  func.func @transform_2(%arg0: i32) -> (i32, i32) {
    %c0_i32 = arith.constant 0 : i32
    %c0_i32_0 = arith.constant 0 : i32
    %c0_i32_1 = arith.constant 0 : i32
    return %c0_i32, %c0_i32_0 : i32, i32
  }
  func.func @transform_3(%arg0: i32) -> (i32, i32) {
    %c0_i32 = arith.constant 0 : i32
    %c0_i32_0 = arith.constant 0 : i32
    return %arg0, %c0_i32 : i32, i32
  }
}

</mosaic_0001>

<bundles_post_ra>
// kernel: mlp_forward.1
= control target key start
LH: loop header
LB: loop body
LE: loop exit
PB: predicated region body
PF: predicated region fallthrough
CT: control target
= control target key end

     0   :  { %v537_v47 = vlaneseq  ;;  %s4577_s1 = inlined_call_operand.vmem [shape: f32[4096,128], index: 1, kind: input, shape index: {}]   ;;  %s4578_s0 = inlined_call_operand.vmem [shape: f32[1,4096], index: 0, kind: input, shape index: {}]   ;;  %s4579_s2 = inlined_call_operand.<no memory space> [shape: f32[1,1], index: 2, kind: input, shape index: {}]   ;;  %s4580_s3 = inlined_call_operand.vmem [shape: f32[1,128], index: 3, kind: output, shape index: {}]  }
   0x1   :  { %v35_v0 = vld [vmem:[%s4577_s1 + $0x80] sm:$0xff]  ;;  %v36_v1 = vld [vmem:[%s4577_s1 + $0x88] sm:$0xff]  ;;  %v37_v11 = vld [vmem:[%s4577_s1 + $0x90] sm:$0xff] }
   0x2   :  { %v19_v2 = vld [vmem:[%s4577_s1] sm:$0xff]  ;;  %v2389_v3 = vpack.c.bf16 %v36_v1, %v35_v0  ;;  %v20_v4 = vld [vmem:[%s4577_s1 + $0x8] sm:$0xff]  ;;  %v38_v13 = vld [vmem:[%s4577_s1 + $0x98] sm:$0xff]  ;;  %v3051_v61 = vshrl.u32 %v537_v47, 7 }
   0x3   :  { %v67_v5 = vld [vmem:[%s4577_s1 + $0x180] sm:$0xff]  ;;  %v68_v6 = vld [vmem:[%s4577_s1 + $0x188] sm:$0xff]  ;;  %v2391_v7 = vpack.c.bf16 %v20_v4, %v19_v2  ;;  %v21_v14 = vld [vmem:[%s4577_s1 + $0x10] sm:$0xff]  ;;  %v2393_v16 = vpack.c.bf16 %v38_v13, %v37_v11 }
   0x4   :  { %v2421_v8 = vpack.c.bf16 %v68_v6, %v67_v5  ;;  %v51_v9 = vld [vmem:[%s4577_s1 + $0x100] sm:$0xff]  ;;  %v52_v10 = vld [vmem:[%s4577_s1 + $0x108] sm:$0xff]  ;;  %2390 = vmatprep.subr.bf16.mxu0 %v2389_v3  ;;  %v22_v15 = vld [vmem:[%s4577_s1 + $0x18] sm:$0xff]  ;;  %v3081_v11 = vsub.s32 3, %v3051_v61 }
   0x5   :  { %v2423_v12 = vpack.c.bf16 %v52_v10, %v51_v9  ;;  %2392 = vmatpush3.bf16.msra.mxu0 %v2391_v7  ;;  %v2395_v17 = vpack.c.bf16 %v22_v15, %v21_v14  ;;  %v69_v18 = vld [vmem:[%s4577_s1 + $0x190] sm:$0xff]  ;;  %v70_v19 = vld [vmem:[%s4577_s1 + $0x198] sm:$0xff]  ;;  %v39_v23 = vld [vmem:[%s4577_s1 + $0xa0] sm:$0xff]  ;;  %v3078_v10 = vsub.s32 1, %v3051_v61 }
   0x6   :  { %2422 = vmatprep.subr.bf16.mxu1 %v2421_v8  ;;  %v53_v20 = vld [vmem:[%s4577_s1 + $0x110] sm:$0xff]  ;;  %v2425_v21 = vpack.c.bf16 %v70_v19, %v69_v18  ;;  %v54_v22 = vld [vmem:[%s4577_s1 + $0x118] sm:$0xff]  ;;  %v40_v24 = vld [vmem:[%s4577_s1 + $0xa8] sm:$0xff]  ;;  %2394 = vmatprep.subr.bf16.mxu0 %v2393_v16 }
   0x7   :  { %2424 = vmatpush3.bf16.msra.mxu1 %v2423_v12  ;;  %v2427_v25 = vpack.c.bf16 %v54_v22, %v53_v20  ;;  %v2397_v26 = vpack.c.bf16 %v40_v24, %v39_v23  ;;  %v23_v27 = vld [vmem:[%s4577_s1 + $0x20] sm:$0xff]  ;;  %v24_v28 = vld [vmem:[%s4577_s1 + $0x28] sm:$0xff]  ;;  %v41_v35 = vld [vmem:[%s4577_s1 + $0xb0] sm:$0xff] }
   0x8   :  { %v71_v29 = vld [vmem:[%s4577_s1 + $0x1a0] sm:$0xff]  ;;  %2426 = vmatprep.subr.bf16.mxu1 %v2425_v21  ;;  %v72_v30 = vld [vmem:[%s4577_s1 + $0x1a8] sm:$0xff]  ;;  %v2399_v33 = vpack.c.bf16 %v24_v28, %v23_v27  ;;  %v42_v36 = vld [vmem:[%s4577_s1 + $0xb8] sm:$0xff] }
   0x9   :  { %v55_v31 = vld [vmem:[%s4577_s1 + $0x120] sm:$0xff]  ;;  %v56_v32 = vld [vmem:[%s4577_s1 + $0x128] sm:$0xff]  ;;  %2396 = vmatpush3.bf16.msra.mxu0 %v2395_v17  ;;  %v2429_v34 = vpack.c.bf16 %v72_v30, %v71_v29  ;;  %v25_v37 = vld [vmem:[%s4577_s1 + $0x30] sm:$0xff]  ;;  %v2401_v39 = vpack.c.bf16 %v42_v36, %v41_v35 }
   0xa   :  { %2398 = vmatprep.subr.bf16.mxu0 %v2397_v26  ;;  %v2431_v38 = vpack.c.bf16 %v56_v32, %v55_v31  ;;  %v26_v40 = vld [vmem:[%s4577_s1 + $0x38] sm:$0xff]  ;;  %v73_v41 = vld [vmem:[%s4577_s1 + $0x1b0] sm:$0xff]  ;;  %v43_v46 = vld [vmem:[%s4577_s1 + $0xc0] sm:$0xff] }
   0xb   :  { %2428 = vmatpush3.bf16.msra.mxu1 %v2427_v25  ;;  %v74_v42 = vld [vmem:[%s4577_s1 + $0x1b8] sm:$0xff]  ;;  %v57_v44 = vld [vmem:[%s4577_s1 + $0x130] sm:$0xff]  ;;  %v44_v48 = vld [vmem:[%s4577_s1 + $0xc8] sm:$0xff]  ;;  %v2403_v49 = vpack.c.bf16 %v26_v40, %v25_v37 }
   0xc   :  { %2430 = vmatprep.subr.bf16.mxu1 %v2429_v34  ;;  %v2433_v43 = vpack.c.bf16 %v74_v42, %v73_v41  ;;  %v58_v45 = vld [vmem:[%s4577_s1 + $0x138] sm:$0xff]  ;;  %v75_v50 = vld [vmem:[%s4577_s1 + $0x1c0] sm:$0xff]  ;;  %v76_v51 = vld [vmem:[%s4577_s1 + $0x1c8] sm:$0xff]  ;;  %v2405_v53 = vpack.c.bf16 %v44_v48, %v43_v46 }
   0xd   :  { %2400 = vmatpush3.bf16.msra.mxu0 %v2399_v33  ;;  %v2435_v52 = vpack.c.bf16 %v58_v45, %v57_v44  ;;  %v27_v54 = vld [vmem:[%s4577_s1 + $0x40] sm:$0xff]  ;;  %v28_v55 = vld [vmem:[%s4577_s1 + $0x48] sm:$0xff]  ;;  %v2437_v57 = vpack.c.bf16 %v76_v51, %v75_v50  ;;  %v45_v59 = vld [vmem:[%s4577_s1 + $0xd0] sm:$0xff] }
   0xe   :  { %2402 = vmatprep.subr.bf16.mxu0 %v2401_v39  ;;  %v59_v56 = vld [vmem:[%s4577_s1 + $0x140] sm:$0xff]  ;;  %v60_v58 = vld [vmem:[%s4577_s1 + $0x148] sm:$0xff]  ;;  %v46_v60 = vld [vmem:[%s4577_s1 + $0xd8] sm:$0xff]  ;;  %v2407_v0 = vpack.c.bf16 %v28_v55, %v27_v54  ;;  %v3141_v39 = vsub.s32 0, %v3051_v61 }
   0xf   :  { %2432 = vmatpush3.bf16.msra.mxu1 %v2431_v38  ;;  %v77_v62 = vld [vmem:[%s4577_s1 + $0x1d0] sm:$0xff]  ;;  %v78_v63 = vld [vmem:[%s4577_s1 + $0x1d8] sm:$0xff]  ;;  %v2439_v1 = vpack.c.bf16 %v60_v58, %v59_v56  ;;  %v2409_v2 = vpack.c.bf16 %v46_v60, %v45_v59  ;;  %v47_v8 = vld [vmem:[%s4577_s1 + $0xe0] sm:$0xff] }
  0x10   :  { %2434 = vmatprep.subr.bf16.mxu1 %v2433_v43  ;;  %v29_v3 = vld [vmem:[%s4577_s1 + $0x50] sm:$0xff]  ;;  %v30_v4 = vld [vmem:[%s4577_s1 + $0x58] sm:$0xff]  ;;  %v2441_v6 = vpack.c.bf16 %v78_v63, %v77_v62  ;;  %v48_v9 = vld [vmem:[%s4577_s1 + $0xe8] sm:$0xff]  ;;  %v3150_v43 = vsub.s32 2, %v3051_v61 }
  0x11   :  { %2404 = vmatpush3.bf16.msra.mxu0 %v2403_v49  ;;  %v61_v5 = vld [vmem:[%s4577_s1 + $0x150] sm:$0xff]  ;;  %v62_v7 = vld [vmem:[%s4577_s1 + $0x158] sm:$0xff]  ;;  %v79_v12 = vld [vmem:[%s4577_s1 + $0x1e0] sm:$0xff]  ;;  %v2411_v14 = vpack.c.bf16 %v30_v4, %v29_v3  ;;  %v2413_v17 = vpack.c.bf16 %v48_v9, %v47_v8 }
  0x12   :  { %2406 = vmatprep.subr.bf16.mxu0 %v2405_v53  ;;  %v80_v13 = vld [vmem:[%s4577_s1 + $0x1e8] sm:$0xff]  ;;  %v31_v15 = vld [vmem:[%s4577_s1 + $0x60] sm:$0xff]  ;;  %v2443_v16 = vpack.c.bf16 %v62_v7, %v61_v5  ;;  %v49_v23 = vld [vmem:[%s4577_s1 + $0xf0] sm:$0xff]  ;;  %v3171_v53 = vsub.s32 5, %v3051_v61 }
  0x13   :  { %2436 = vmatpush3.bf16.msra.mxu1 %v2435_v52  ;;  %v32_v18 = vld [vmem:[%s4577_s1 + $0x68] sm:$0xff]  ;;  %v63_v19 = vld [vmem:[%s4577_s1 + $0x160] sm:$0xff]  ;;  %v2445_v21 = vpack.c.bf16 %v80_v13, %v79_v12  ;;  %v50_v24 = vld [vmem:[%s4577_s1 + $0xf8] sm:$0xff] }
  0x14   :  { %2438 = vmatprep.subr.bf16.mxu1 %v2437_v57  ;;  %v3101_v20 = vld [vmem:[%s4578_s0] sm:$0xff]  ;;  %v64_v22 = vld [vmem:[%s4577_s1 + $0x168] sm:$0xff]  ;;  %v81_v27 = vld [vmem:[%s4577_s1 + $0x1f0] sm:$0xff]  ;;  %v2415_v29 = vpack.c.bf16 %v32_v18, %v31_v15  ;;  %v2417_v31 = vpack.c.bf16 %v50_v24, %v49_v23  ;;  %v3182_v57 = vsub.s32 7, %v3051_v61 }
  0x15   :  { %2408 = vmatpush3.bf16.msra.mxu0 %v2407_v0  ;;  %v544_v25 = vrot.slane %v3101_v20, %v3078_v10  ;;  %v552_v26 = vrot.slane %v3101_v20, %v3081_v11  ;;  %v82_v28 = vld [vmem:[%s4577_s1 + $0x1f8] sm:$0xff]  ;;  %v2447_v30 = vpack.c.bf16 %v64_v22, %v63_v19  ;;  %v33_v32 = vld [vmem:[%s4577_s1 + $0x70] sm:$0xff]  ;;  %v99_v37 = vld [vmem:[%s4577_s1 + $0x280] sm:$0xff]  ;;  %v540_v54 = vrot.slane %v3101_v20, %v3141_v39 }
  0x16   :  { %2410 = vmatprep.subr.bf16.mxu0 %v2409_v2  ;;  %v34_v33 = vld [vmem:[%s4577_s1 + $0x78] sm:$0xff]  ;;  %v65_v34 = vld [vmem:[%s4577_s1 + $0x170] sm:$0xff]  ;;  %v2449_v35 = vpack.c.bf16 %v82_v28, %v81_v27  ;;  %v100_v38 = vld [vmem:[%s4577_s1 + $0x288] sm:$0xff]  ;;  %v548_v59 = vrot.slane %v3101_v20, %v3150_v43  ;;  %v568_v9 = vrot.slane %v3101_v20, %v3182_v57 }
  0x17   :  { %2440 = vmatpush3.bf16.msra.mxu1 %v2439_v1  ;;  %761 = vmatprep.mubr.f32.mxu0 %v544_v25  ;;  %v66_v36 = vld [vmem:[%s4577_s1 + $0x178] sm:$0xff]  ;;  %v131_v40 = vld [vmem:[%s4577_s1 + $0x380] sm:$0xff]  ;;  %v132_v41 = vld [vmem:[%s4577_s1 + $0x388] sm:$0xff]  ;;  %v2419_v42 = vpack.c.bf16 %v34_v33, %v33_v32  ;;  %v2453_v45 = vpack.c.bf16 %v100_v38, %v99_v37 }
  0x18   :  { %2442 = vmatprep.subr.bf16.mxu1 %v2441_v6  ;;  %831 = vmatprep.mubr.f32.mxu1 %v552_v26  ;;  %v2451_v44 = vpack.c.bf16 %v66_v36, %v65_v34  ;;  %v83_v46 = vld [vmem:[%s4577_s1 + $0x200] sm:$0xff]  ;;  %v84_v47 = vld [vmem:[%s4577_s1 + $0x208] sm:$0xff]  ;;  %v2485_v49 = vpack.c.bf16 %v132_v41, %v131_v40  ;;  %v101_v51 = vld [vmem:[%s4577_s1 + $0x290] sm:$0xff]  ;;  %v560_v6 = vrot.slane %v3101_v20, %v3171_v53 }
  0x19   :  { %2412 = vmatpush3.bf16.msra.mxu0 %v2411_v14  ;;  %v115_v48 = vld [vmem:[%s4577_s1 + $0x300] sm:$0xff]  ;;  %v116_v50 = vld [vmem:[%s4577_s1 + $0x308] sm:$0xff]  ;;  %v102_v52 = vld [vmem:[%s4577_s1 + $0x298] sm:$0xff]  ;;  %v2455_v58 = vpack.c.bf16 %v84_v47, %v83_v46 }
  0x1a   :  { %2414 = vmatprep.subr.bf16.mxu0 %v2413_v17  ;;  %v133_v55 = vld [vmem:[%s4577_s1 + $0x390] sm:$0xff]  ;;  %v134_v56 = vld [vmem:[%s4577_s1 + $0x398] sm:$0xff]  ;;  %v2487_v60 = vpack.c.bf16 %v116_v50, %v115_v48  ;;  %v2457_v62 = vpack.c.bf16 %v102_v52, %v101_v51  ;;  %v103_v4 = vld [vmem:[%s4577_s1 + $0x2a0] sm:$0xff] }
  0x1b   :  { %2444 = vmatpush3.bf16.msra.mxu1 %v2443_v16  ;;  %v85_v63 = vld [vmem:[%s4577_s1 + $0x210] sm:$0xff]  ;;  %v86_v0 = vld [vmem:[%s4577_s1 + $0x218] sm:$0xff]  ;;  %v2489_v2 = vpack.c.bf16 %v134_v56, %v133_v55  ;;  %v104_v5 = vld [vmem:[%s4577_s1 + $0x2a8] sm:$0xff] }
  0x1c   :  { %2446 = vmatprep.subr.bf16.mxu1 %v2445_v21  ;;  %v117_v1 = vld [vmem:[%s4577_s1 + $0x310] sm:$0xff]  ;;  %v118_v3 = vld [vmem:[%s4577_s1 + $0x318] sm:$0xff]  ;;  %v135_v7 = vld [vmem:[%s4577_s1 + $0x3a0] sm:$0xff]  ;;  %v2459_v12 = vpack.c.bf16 %v86_v0, %v85_v63  ;;  %v2461_v14 = vpack.c.bf16 %v104_v5, %v103_v4 }
  0x1d   :  { %2416 = vmatpush3.bf16.msra.mxu0 %v2415_v29  ;;  %v136_v8 = vld [vmem:[%s4577_s1 + $0x3a8] sm:$0xff]  ;;  %v2491_v13 = vpack.c.bf16 %v118_v3, %v117_v1  ;;  %v87_v15 = vld [vmem:[%s4577_s1 + $0x220] sm:$0xff]  ;;  %v105_v21 = vld [vmem:[%s4577_s1 + $0x2b0] sm:$0xff] }
  0x1e   :  { %2418 = vmatprep.subr.bf16.mxu0 %v2417_v31  ;;  %v88_v16 = vld [vmem:[%s4577_s1 + $0x228] sm:$0xff]  ;;  %v119_v17 = vld [vmem:[%s4577_s1 + $0x320] sm:$0xff]  ;;  %v2493_v18 = vpack.c.bf16 %v136_v8, %v135_v7  ;;  %v106_v22 = vld [vmem:[%s4577_s1 + $0x2b8] sm:$0xff] }
  0x1f   :  { %2448 = vmatpush3.bf16.msra.mxu1 %v2447_v30  ;;  %v120_v19 = vld [vmem:[%s4577_s1 + $0x328] sm:$0xff]  ;;  %v137_v23 = vld [vmem:[%s4577_s1 + $0x3b0] sm:$0xff]  ;;  %v138_v24 = vld [vmem:[%s4577_s1 + $0x3b8] sm:$0xff]  ;;  %v2463_v25 = vpack.c.bf16 %v88_v16, %v87_v15  ;;  %v2465_v27 = vpack.c.bf16 %v106_v22, %v105_v21 }
  0x20   :  { %2450 = vmatprep.subr.bf16.mxu1 %v2449_v35  ;;  %v2495_v26 = vpack.c.bf16 %v120_v19, %v119_v17  ;;  %v89_v28 = vld [vmem:[%s4577_s1 + $0x230] sm:$0xff]  ;;  %v90_v29 = vld [vmem:[%s4577_s1 + $0x238] sm:$0xff]  ;;  %v2497_v31 = vpack.c.bf16 %v138_v24, %v137_v23  ;;  %v107_v33 = vld [vmem:[%s4577_s1 + $0x2c0] sm:$0xff] }
  0x21   :  { %2420 = vmatpush3.bf16.msra.mxu0 %v2419_v42  ;;  %v121_v30 = vld [vmem:[%s4577_s1 + $0x330] sm:$0xff]  ;;  %v122_v32 = vld [vmem:[%s4577_s1 + $0x338] sm:$0xff]  ;;  %v108_v34 = vld [vmem:[%s4577_s1 + $0x2c8] sm:$0xff]  ;;  %v2467_v37 = vpack.c.bf16 %v90_v29, %v89_v28 }
  0x22   :  { %2454 = vmatprep.subr.bf16.mxu0 %v2453_v45  ;;  %v139_v35 = vld [vmem:[%s4577_s1 + $0x3c0] sm:$0xff]  ;;  %v140_v36 = vld [vmem:[%s4577_s1 + $0x3c8] sm:$0xff]  ;;  %v2499_v38 = vpack.c.bf16 %v122_v32, %v121_v30  ;;  %v2469_v40 = vpack.c.bf16 %v108_v34, %v107_v33  ;;  %v109_v47 = vld [vmem:[%s4577_s1 + $0x2d0] sm:$0xff] }
  0x23   :  { %2452 = vmatpush3.bf16.msra.mxu1 %v2451_v44  ;;  %v91_v41 = vld [vmem:[%s4577_s1 + $0x240] sm:$0xff]  ;;  %v92_v42 = vld [vmem:[%s4577_s1 + $0x248] sm:$0xff]  ;;  %v2501_v45 = vpack.c.bf16 %v140_v36, %v139_v35  ;;  %v110_v48 = vld [vmem:[%s4577_s1 + $0x2d8] sm:$0xff] }
  0x24   :  { %2486 = vmatprep.subr.bf16.mxu1 %v2485_v49  ;;  %762 = vmatmul.mubr.f32.vlgmr.msra.gmra.mrb[0].mxu0 %v540_v54  ;;  %v123_v44 = vld [vmem:[%s4577_s1 + $0x340] sm:$0xff]  ;;  %v124_v46 = vld [vmem:[%s4577_s1 + $0x348] sm:$0xff]  ;;  %v141_v49 = vld [vmem:[%s4577_s1 + $0x3d0] sm:$0xff]  ;;  %v2471_v51 = vpack.c.bf16 %v92_v42, %v91_v41  ;;  %v2473_v54 = vpack.c.bf16 %v110_v48, %v109_v47 }
  0x25   :  { %2456 = vmatpush3.bf16.msra.mxu0 %v2455_v58  ;;  %901 = vmatprep.mubr.f32.mxu0 %v560_v6  ;;  %v142_v50 = vld [vmem:[%s4577_s1 + $0x3d8] sm:$0xff]  ;;  %v2503_v52 = vpack.c.bf16 %v124_v46, %v123_v44  ;;  %v93_v55 = vld [vmem:[%s4577_s1 + $0x250] sm:$0xff]  ;;  %v112_v63 = vld [vmem:[%s4577_s1 + $0x2e8] sm:$0xff] }
  0x26   :  { %832 = vmatmul.mubr.f32.vlgmr.msra.gmra.mrb[0].mxu1 %v548_v59  ;;  %2458 = vmatprep.subr.bf16.mxu0 %v2457_v62  ;;  %v94_v56 = vld [vmem:[%s4577_s1 + $0x258] sm:$0xff]  ;;  %v125_v58 = vld [vmem:[%s4577_s1 + $0x350] sm:$0xff]  ;;  %v2505_v59 = vpack.c.bf16 %v142_v50, %v141_v49  ;;  %v111_v62 = vld [vmem:[%s4577_s1 + $0x2e0] sm:$0xff] }
  0x27   :  { %2488 = vmatpush3.bf16.msra.mxu1 %v2487_v60  ;;  %971 = vmatprep.mubr.f32.mxu1 %v568_v9  ;;  %v126_v60 = vld [vmem:[%s4577_s1 + $0x358] sm:$0xff]  ;;  %v143_v0 = vld [vmem:[%s4577_s1 + $0x3e0] sm:$0xff]  ;;  %v144_v1 = vld [vmem:[%s4577_s1 + $0x3e8] sm:$0xff]  ;;  %v2477_v4 = vpack.c.bf16 %v112_v63, %v111_v62 }
  0x28   :  { %2490 = vmatprep.subr.bf16.mxu1 %v2489_v2  ;;  %v2475_v2 = vpack.c.bf16 %v94_v56, %v93_v55  ;;  %v2507_v3 = vpack.c.bf16 %v126_v60, %v125_v58  ;;  %v95_v5 = vld [vmem:[%s4577_s1 + $0x260] sm:$0xff]  ;;  %v96_v6 = vld [vmem:[%s4577_s1 + $0x268] sm:$0xff]  ;;  %v2509_v8 = vpack.c.bf16 %v144_v1, %v143_v0  ;;  %v146_v15 = vld [vmem:[%s4577_s1 + $0x3f8] sm:$0xff] }
  0x29   :  { %2460 = vmatpush3.bf16.msra.mxu0 %v2459_v12  ;;  %v127_v7 = vld [vmem:[%s4577_s1 + $0x360] sm:$0xff]  ;;  %v128_v9 = vld [vmem:[%s4577_s1 + $0x368] sm:$0xff]  ;;  %v113_v12 = vld [vmem:[%s4577_s1 + $0x2f0] sm:$0xff]  ;;  %v2479_v16 = vpack.c.bf16 %v96_v6, %v95_v5 }
  0x2a   :  { %2462 = vmatprep.subr.bf16.mxu0 %v2461_v14  ;;  %v145_v14 = vld [vmem:[%s4577_s1 + $0x3f0] sm:$0xff]  ;;  %v2511_v17 = vpack.c.bf16 %v128_v9, %v127_v7  ;;  %v98_v21 = vld [vmem:[%s4577_s1 + $0x278] sm:$0xff]  ;;  %v195_v28 = vld [vmem:[%s4577_s1 + $0x580] sm:$0xff] }
  0x2b   :  { %2492 = vmatpush3.bf16.msra.mxu1 %v2491_v13  ;;  %v114_v13 = vld [vmem:[%s4577_s1 + $0x2f8] sm:$0xff]  ;;  %v97_v19 = vld [vmem:[%s4577_s1 + $0x270] sm:$0xff]  ;;  %v2513_v23 = vpack.c.bf16 %v146_v15, %v145_v14  ;;  %v196_v29 = vld [vmem:[%s4577_s1 + $0x588] sm:$0xff] }
  0x2c   :  { %2494 = vmatprep.subr.bf16.mxu1 %v2493_v18  ;;  %v2481_v18 = vpack.c.bf16 %v114_v13, %v113_v12  ;;  %v129_v22 = vld [vmem:[%s4577_s1 + $0x370] sm:$0xff]  ;;  %v130_v24 = vld [vmem:[%s4577_s1 + $0x378] sm:$0xff]  ;;  %v2483_v30 = vpack.c.bf16 %v98_v21, %v97_v19  ;;  %v147_v34 = vld [vmem:[%s4577_s1 + $0x400] sm:$0xff] }
  0x2d   :  { %2464 = vmatpush3.bf16.msra.mxu0 %v2463_v25  ;;  %v163_v25 = vld [vmem:[%s4577_s1 + $0x480] sm:$0xff]  ;;  %v2515_v32 = vpack.c.bf16 %v130_v24, %v129_v22  ;;  %v148_v35 = vld [vmem:[%s4577_s1 + $0x408] sm:$0xff]  ;;  %v197_v42 = vld [vmem:[%s4577_s1 + $0x590] sm:$0xff] }
  0x2e   :  { %2466 = vmatprep.subr.bf16.mxu0 %v2465_v27  ;;  %v3353_v27 = vsub.s32 4, %v3051_v61  ;;  %v179_v36 = vld [vmem:[%s4577_s1 + $0x500] sm:$0xff]  ;;  %v198_v44 = vld [vmem:[%s4577_s1 + $0x598] sm:$0xff]  ;;  %v3395_v47 = vld [vmem:[%s4578_s0 + $0x8] sm:$0xff] }
  0x2f   :  { %2496 = vmatpush3.bf16.msra.mxu1 %v2495_v26  ;;  %v164_v26 = vld [vmem:[%s4577_s1 + $0x488] sm:$0xff]  ;;  %v149_v50 = vld [vmem:[%s4577_s1 + $0x410] sm:$0xff]  ;;  %v167_v55 = vld [vmem:[%s4577_s1 + $0x4a0] sm:$0xff]  ;;  %v576_v58 = vrot.slane %v3395_v47, %v3078_v10  ;;  %v584_v62 = vrot.slane %v3395_v47, %v3081_v11 }
  0x30   :  { %2498 = vmatprep.subr.bf16.mxu1 %v2497_v31  ;;  %v3362_v31 = vsub.s32 6, %v3051_v61  ;;  %v2517_v33 = vpack.c.bf16 %v164_v26, %v163_v25  ;;  %v180_v61 = vld [vmem:[%s4577_s1 + $0x508] sm:$0xff]  ;;  %v556_v41 = vrot.slane %v3101_v20, %v3353_v27  ;;  %v169_v7 = vld [vmem:[%s4577_s1 + $0x4b0] sm:$0xff]  ;;  %v202_v12 = vld [vmem:[%s4577_s1 + $0x5b8] sm:$0xff] }
  0x31   :  { %2468 = vmatpush3.bf16.msra.mxu0 %v2467_v37  ;;  %v2549_v37 = vpack.c.bf16 %v196_v29, %v195_v28  ;;  %v2551_v48 = vpack.c.bf16 %v180_v61, %v179_v36  ;;  %v168_v56 = vld [vmem:[%s4577_s1 + $0x4a8] sm:$0xff]  ;;  %v201_v9 = vld [vmem:[%s4577_s1 + $0x5b0] sm:$0xff]  ;;  %v186_v21 = vld [vmem:[%s4577_s1 + $0x538] sm:$0xff] }
  0x32   :  { %2470 = vmatprep.subr.bf16.mxu0 %v2469_v40  ;;  %v166_v40 = vld [vmem:[%s4577_s1 + $0x498] sm:$0xff]  ;;  %v564_v46 = vrot.slane %v3101_v20, %v3362_v31  ;;  %v181_v20 = vld [vmem:[%s4577_s1 + $0x510] sm:$0xff]  ;;  %v200_v60 = vld [vmem:[%s4577_s1 + $0x5a8] sm:$0xff]  ;;  %v2525_v1 = vpack.c.bf16 %v168_v56, %v167_v55  ;;  %v2561_v19 = vpack.c.bf16 %v202_v12, %v201_v9 }
  0x33   :  { %2500 = vmatpush3.bf16.msra.mxu1 %v2499_v38  ;;  %v165_v38 = vld [vmem:[%s4577_s1 + $0x490] sm:$0xff]  ;;  %v184_v6 = vld [vmem:[%s4577_s1 + $0x528] sm:$0xff]  ;;  %v171_v22 = vld [vmem:[%s4577_s1 + $0x4c0] sm:$0xff] }
  0x34   :  { %2502 = vmatprep.subr.bf16.mxu1 %v2501_v45  ;;  %v2519_v45 = vpack.c.bf16 %v148_v35, %v147_v34  ;;  %v2521_v49 = vpack.c.bf16 %v166_v40, %v165_v38  ;;  %v203_v24 = vld [vmem:[%s4577_s1 + $0x5c0] sm:$0xff]  ;;  %v204_v25 = vld [vmem:[%s4577_s1 + $0x5c8] sm:$0xff]  ;;  %v173_v36 = vld [vmem:[%s4577_s1 + $0x4d0] sm:$0xff] }
  0x35   :  { %2472 = vmatpush3.bf16.msra.mxu0 %v2471_v51  ;;  %v150_v51 = vld [vmem:[%s4577_s1 + $0x418] sm:$0xff]  ;;  %v2565_v34 = vpack.c.bf16 %v204_v25, %v203_v24  ;;  %v188_v35 = vld [vmem:[%s4577_s1 + $0x548] sm:$0xff]  ;;  %v205_v61 = vld [vmem:[%s4577_s1 + $0x5d0] sm:$0xff] }
  0x36   :  { %2474 = vmatprep.subr.bf16.mxu0 %v2473_v54  ;;  %v182_v54 = vld [vmem:[%s4577_s1 + $0x518] sm:$0xff]  ;;  %v2523_v63 = vpack.c.bf16 %v150_v51, %v149_v50  ;;  %v175_v50 = vld [vmem:[%s4577_s1 + $0x4e0] sm:$0xff]  ;;  %v176_v51 = vld [vmem:[%s4577_s1 + $0x4e8] sm:$0xff] }
  0x37   :  { %2504 = vmatpush3.bf16.msra.mxu1 %v2503_v52  ;;  %v2553_v52 = vpack.c.bf16 %v198_v44, %v197_v42  ;;  %v2555_v0 = vpack.c.bf16 %v182_v54, %v181_v20  ;;  %v206_v38 = vld [vmem:[%s4577_s1 + $0x5d8] sm:$0xff]  ;;  %v157_v44 = vld [vmem:[%s4577_s1 + $0x450] sm:$0xff]  ;;  %v207_v20 = vld [vmem:[%s4577_s1 + $0x5e0] sm:$0xff]  ;;  %v2541_v56 = vpack.c.bf16 %v176_v51, %v175_v50  ;;  %v600_v50 = vrot.slane %v3395_v47, %v3182_v57 }
  0x38   :  { %2506 = vmatprep.subr.bf16.mxu1 %v2505_v59  ;;  %v199_v59 = vld [vmem:[%s4577_s1 + $0x5a0] sm:$0xff]  ;;  %v193_v9 = vld [vmem:[%s4577_s1 + $0x570] sm:$0xff] }
  0x39   :  { %2476 = vmatpush3.bf16.msra.mxu0 %v2475_v2  ;;  %v151_v2 = vld [vmem:[%s4577_s1 + $0x420] sm:$0xff]  ;;  %v2557_v5 = vpack.c.bf16 %v200_v60, %v199_v59  ;;  %v160_v59 = vld [vmem:[%s4577_s1 + $0x468] sm:$0xff] }
  0x3a   :  { %2478 = vmatprep.subr.bf16.mxu0 %v2477_v4  ;;  %v183_v4 = vld [vmem:[%s4577_s1 + $0x520] sm:$0xff] }
  0x3b   :  { %2508 = vmatpush3.bf16.msra.mxu1 %v2507_v3  ;;  %v152_v3 = vld [vmem:[%s4577_s1 + $0x428] sm:$0xff]  ;;  %v2559_v14 = vpack.c.bf16 %v184_v6, %v183_v4  ;;  %v191_v60 = vld [vmem:[%s4577_s1 + $0x560] sm:$0xff] }
  0x3c   :  { %2510 = vmatprep.subr.bf16.mxu1 %v2509_v8  ;;  %v170_v8 = vld [vmem:[%s4577_s1 + $0x4b8] sm:$0xff]  ;;  %v2527_v13 = vpack.c.bf16 %v152_v3, %v151_v2  ;;  %v209_v2 = vld [vmem:[%s4577_s1 + $0x5f0] sm:$0xff]  ;;  %v243_v24 = vld [vmem:[%s4577_s1 + $0x700] sm:$0xff] }
  0x3d   :  { %2480 = vmatpush3.bf16.msra.mxu0 %v2479_v16  ;;  %v2529_v15 = vpack.c.bf16 %v170_v8, %v169_v7  ;;  %v153_v16 = vld [vmem:[%s4577_s1 + $0x430] sm:$0xff]  ;;  %v210_v3 = vld [vmem:[%s4577_s1 + $0x5f8] sm:$0xff] }
  0x3e   :  { %2482 = vmatprep.subr.bf16.mxu0 %v2481_v18  ;;  %v185_v18 = vld [vmem:[%s4577_s1 + $0x530] sm:$0xff]  ;;  %v162_v8 = vld [vmem:[%s4577_s1 + $0x478] sm:$0xff]  ;;  %v2577_v12 = vpack.c.bf16 %v210_v3, %v209_v2 }
  0x3f   :  { %2512 = vmatpush3.bf16.msra.mxu1 %v2511_v17  ;;  %v154_v17 = vld [vmem:[%s4577_s1 + $0x438] sm:$0xff]  ;;  %v2563_v28 = vpack.c.bf16 %v186_v21, %v185_v18  ;;  %v161_v7 = vld [vmem:[%s4577_s1 + $0x470] sm:$0xff] }
  0x40   :  { %2514 = vmatprep.subr.bf16.mxu1 %v2513_v23  ;;  %v172_v23 = vld [vmem:[%s4577_s1 + $0x4c8] sm:$0xff]  ;;  %v2531_v26 = vpack.c.bf16 %v154_v17, %v153_v16  ;;  %v259_v16 = vld [vmem:[%s4577_s1 + $0x780] sm:$0xff]  ;;  %v2547_v18 = vpack.c.bf16 %v162_v8, %v161_v7  ;;  %v250_v8 = vld [vmem:[%s4577_s1 + $0x738] sm:$0xff] }
  0x41   :  { %2484 = vmatpush3.bf16.msra.mxu0 %v2483_v30  ;;  %v2533_v29 = vpack.c.bf16 %v172_v23, %v171_v22  ;;  %v155_v30 = vld [vmem:[%s4577_s1 + $0x440] sm:$0xff]  ;;  %v260_v17 = vld [vmem:[%s4577_s1 + $0x788] sm:$0xff] }
  0x42   :  { %2518 = vmatprep.subr.bf16.mxu0 %v2517_v33  ;;  %v187_v33 = vld [vmem:[%s4577_s1 + $0x540] sm:$0xff]  ;;  %v212_v23 = vld [vmem:[%s4577_s1 + $0x608] sm:$0xff]  ;;  %v2613_v25 = vpack.c.bf16 %v260_v17, %v259_v16 }
  0x43   :  { %2516 = vmatpush3.bf16.msra.mxu1 %v2515_v32  ;;  %v156_v32 = vld [vmem:[%s4577_s1 + $0x448] sm:$0xff]  ;;  %v211_v22 = vld [vmem:[%s4577_s1 + $0x600] sm:$0xff] }
  0x44   :  { %2550 = vmatprep.subr.bf16.mxu1 %v2549_v37  ;;  %902 = vmatmul.mubr.f32.vlgmr.msra.gmra.mrb[2].mxu0 %v556_v41  ;;  %v174_v37 = vld [vmem:[%s4577_s1 + $0x4d8] sm:$0xff]  ;;  %v2535_v40 = vpack.c.bf16 %v156_v32, %v155_v30  ;;  %v2567_v41 = vpack.c.bf16 %v188_v35, %v187_v33  ;;  %v572_v30 = vrot.slane %v3395_v47, %v3141_v39  ;;  %v261_v32 = vld [vmem:[%s4577_s1 + $0x790] sm:$0xff] }
  0x45   :  { %2520 = vmatpush3.bf16.msra.mxu0 %v2519_v45  ;;  %1041 = vmatprep.mubr.f32.mxu0 %v576_v58  ;;  %v2537_v42 = vpack.c.bf16 %v174_v37, %v173_v36  ;;  %v158_v45 = vld [vmem:[%s4577_s1 + $0x458] sm:$0xff]  ;;  %v159_v58 = vld [vmem:[%s4577_s1 + $0x460] sm:$0xff]  ;;  %v580_v35 = vrot.slane %v3395_v47, %v3150_v43 }
  0x46   :  { %972 = vmatmul.mubr.f32.vlgmr.msra.gmra.mrb[2].mxu1 %v564_v46  ;;  %2522 = vmatprep.subr.bf16.mxu0 %v2521_v49  ;;  %v189_v46 = vld [vmem:[%s4577_s1 + $0x550] sm:$0xff]  ;;  %v190_v49 = vld [vmem:[%s4577_s1 + $0x558] sm:$0xff]  ;;  %v2539_v54 = vpack.c.bf16 %v158_v45, %v157_v44  ;;  %v2543_v4 = vpack.c.bf16 %v160_v59, %v159_v58  ;;  %v231_v44 = vld [vmem:[%s4577_s1 + $0x6a0] sm:$0xff] }
  0x47   :  { %2552 = vmatpush3.bf16.msra.mxu1 %v2551_v48  ;;  %1111 = vmatprep.mubr.f32.mxu1 %v584_v62  ;;  %v2569_v48 = vpack.c.bf16 %v206_v38, %v205_v61  ;;  %v2571_v55 = vpack.c.bf16 %v190_v49, %v189_v46  ;;  %v262_v33 = vld [vmem:[%s4577_s1 + $0x798] sm:$0xff]  ;;  %v213_v61 = vld [vmem:[%s4577_s1 + $0x610] sm:$0xff]  ;;  %v232_v45 = vld [vmem:[%s4577_s1 + $0x6a8] sm:$0xff]  ;;  %v592_v46 = vrot.slane %v3395_v47, %v3171_v53 }
  0x48   :  { %2554 = vmatprep.subr.bf16.mxu1 %v2553_v52  ;;  %v208_v52 = vld [vmem:[%s4577_s1 + $0x5e8] sm:$0xff]  ;;  %v214_v38 = vld [vmem:[%s4577_s1 + $0x618] sm:$0xff] }
  0x49   :  { %2524 = vmatpush3.bf16.msra.mxu0 %v2523_v63  ;;  %v2573_v62 = vpack.c.bf16 %v208_v52, %v207_v20  ;;  %v192_v63 = vld [vmem:[%s4577_s1 + $0x568] sm:$0xff]  ;;  %v2587_v51 = vpack.c.bf16 %v214_v38, %v213_v61  ;;  %v2589_v52 = vpack.c.bf16 %v232_v45, %v231_v44  ;;  %v239_v61 = vld [vmem:[%s4577_s1 + $0x6e0] sm:$0xff] }
  0x4a   :  { %2526 = vmatprep.subr.bf16.mxu0 %v2525_v1  ;;  %v178_v1 = vld [vmem:[%s4577_s1 + $0x4f8] sm:$0xff]  ;;  %v264_v49 = vld [vmem:[%s4577_s1 + $0x7a8] sm:$0xff] }
  0x4b   :  { %2556 = vmatpush3.bf16.msra.mxu1 %v2555_v0  ;;  %v177_v0 = vld [vmem:[%s4577_s1 + $0x4f0] sm:$0xff]  ;;  %v248_v59 = vld [vmem:[%s4577_s1 + $0x728] sm:$0xff] }
  0x4c   :  { %2558 = vmatprep.subr.bf16.mxu1 %v2557_v5  ;;  %v2575_v5 = vpack.c.bf16 %v192_v63, %v191_v60  ;;  %v2545_v6 = vpack.c.bf16 %v178_v1, %v177_v0  ;;  %v233_v60 = vld [vmem:[%s4577_s1 + $0x6b0] sm:$0xff]  ;;  %v266_v0 = vld [vmem:[%s4577_s1 + $0x7b8] sm:$0xff]  ;;  %v240_v38 = vld [vmem:[%s4577_s1 + $0x6e8] sm:$0xff] }
  0x4d   :  { %2528 = vmatpush3.bf16.msra.mxu0 %v2527_v13  ;;  %v194_v13 = vld [vmem:[%s4577_s1 + $0x578] sm:$0xff]  ;;  %v265_v63 = vld [vmem:[%s4577_s1 + $0x7b0] sm:$0xff]  ;;  %v2605_v45 = vpack.c.bf16 %v240_v38, %v239_v61 }
  0x4e   :  { %2530 = vmatprep.subr.bf16.mxu0 %v2529_v15  ;;  %v228_v15 = vld [vmem:[%s4577_s1 + $0x688] sm:$0xff]  ;;  %v2625_v7 = vpack.c.bf16 %v266_v0, %v265_v63  ;;  %v257_v63 = vld [vmem:[%s4577_s1 + $0x770] sm:$0xff] }
  0x4f   :  { %2560 = vmatpush3.bf16.msra.mxu1 %v2559_v14  ;;  %v227_v14 = vld [vmem:[%s4577_s1 + $0x680] sm:$0xff] }
  0x50   :  { %2562 = vmatprep.subr.bf16.mxu1 %v2561_v19  ;;  %v2579_v19 = vpack.c.bf16 %v194_v13, %v193_v9  ;;  %v2581_v21 = vpack.c.bf16 %v228_v15, %v227_v14  ;;  %v235_v9 = vld [vmem:[%s4577_s1 + $0x6c0] sm:$0xff]  ;;  %v268_v14 = vld [vmem:[%s4577_s1 + $0x7c8] sm:$0xff] }
  0x51   :  { %2532 = vmatpush3.bf16.msra.mxu0 %v2531_v26  ;;  %v244_v26 = vld [vmem:[%s4577_s1 + $0x708] sm:$0xff]  ;;  %v267_v13 = vld [vmem:[%s4577_s1 + $0x7c0] sm:$0xff] }
  0x52   :  { %2534 = vmatprep.subr.bf16.mxu0 %v2533_v29  ;;  %v230_v29 = vld [vmem:[%s4577_s1 + $0x698] sm:$0xff]  ;;  %v2615_v36 = vpack.c.bf16 %v244_v26, %v243_v24  ;;  %v237_v24 = vld [vmem:[%s4577_s1 + $0x6d0] sm:$0xff] }
  0x53   :  { %2564 = vmatpush3.bf16.msra.mxu1 %v2563_v28  ;;  %v229_v28 = vld [vmem:[%s4577_s1 + $0x690] sm:$0xff] }
  0x54   :  { %2566 = vmatprep.subr.bf16.mxu1 %v2565_v34  ;;  %v2583_v34 = vpack.c.bf16 %v212_v23, %v211_v22  ;;  %v2585_v37 = vpack.c.bf16 %v230_v29, %v229_v28  ;;  %v2629_v22 = vpack.c.bf16 %v268_v14, %v267_v13  ;;  %v252_v23 = vld [vmem:[%s4577_s1 + $0x748] sm:$0xff]  ;;  %v269_v26 = vld [vmem:[%s4577_s1 + $0x7d0] sm:$0xff]  ;;  %v270_v28 = vld [vmem:[%s4577_s1 + $0x7d8] sm:$0xff] }
  0x55   :  { %2536 = vmatpush3.bf16.msra.mxu0 %v2535_v40  ;;  %v245_v40 = vld [vmem:[%s4577_s1 + $0x710] sm:$0xff]  ;;  %v307_v13 = vld [vmem:[%s4577_s1 + $0x900] sm:$0xff] }
  0x56   :  { %2538 = vmatprep.subr.bf16.mxu0 %v2537_v42  ;;  %v246_v42 = vld [vmem:[%s4577_s1 + $0x718] sm:$0xff] }
  0x57   :  { %2568 = vmatpush3.bf16.msra.mxu1 %v2567_v41  ;;  %v2617_v41 = vpack.c.bf16 %v262_v33, %v261_v32  ;;  %v2619_v20 = vpack.c.bf16 %v246_v42, %v245_v40  ;;  %v221_v33 = vld [vmem:[%s4577_s1 + $0x650] sm:$0xff]  ;;  %v271_v40 = vld [vmem:[%s4577_s1 + $0x7e0] sm:$0xff] }
  0x58   :  { %2570 = vmatprep.subr.bf16.mxu1 %v2569_v48  ;;  %v263_v48 = vld [vmem:[%s4577_s1 + $0x7a0] sm:$0xff] }
  0x59   :  { %2540 = vmatpush3.bf16.msra.mxu0 %v2539_v54  ;;  %v215_v54 = vld [vmem:[%s4577_s1 + $0x620] sm:$0xff]  ;;  %v2621_v58 = vpack.c.bf16 %v264_v49, %v263_v48  ;;  %v224_v48 = vld [vmem:[%s4577_s1 + $0x668] sm:$0xff] }
  0x5a   :  { %2542 = vmatprep.subr.bf16.mxu0 %v2541_v56  ;;  %v247_v56 = vld [vmem:[%s4577_s1 + $0x720] sm:$0xff] }
  0x5b   :  { %2572 = vmatpush3.bf16.msra.mxu1 %v2571_v55  ;;  %v216_v55 = vld [vmem:[%s4577_s1 + $0x628] sm:$0xff]  ;;  %v2623_v2 = vpack.c.bf16 %v248_v59, %v247_v56  ;;  %v255_v49 = vld [vmem:[%s4577_s1 + $0x760] sm:$0xff] }
  0x5c   :  { %2574 = vmatprep.subr.bf16.mxu1 %v2573_v62  ;;  %v234_v62 = vld [vmem:[%s4577_s1 + $0x6b8] sm:$0xff]  ;;  %v2591_v1 = vpack.c.bf16 %v216_v55, %v215_v54  ;;  %v273_v54 = vld [vmem:[%s4577_s1 + $0x7f0] sm:$0xff] }
  0x5d   :  { %2544 = vmatpush3.bf16.msra.mxu0 %v2543_v4  ;;  %v2593_v3 = vpack.c.bf16 %v234_v62, %v233_v60  ;;  %v217_v4 = vld [vmem:[%s4577_s1 + $0x630] sm:$0xff]  ;;  %v274_v55 = vld [vmem:[%s4577_s1 + $0x7f8] sm:$0xff] }
  0x5e   :  { %2546 = vmatprep.subr.bf16.mxu0 %v2545_v6  ;;  %v249_v6 = vld [vmem:[%s4577_s1 + $0x730] sm:$0xff]  ;;  %v226_v62 = vld [vmem:[%s4577_s1 + $0x678] sm:$0xff]  ;;  %v2641_v0 = vpack.c.bf16 %v274_v55, %v273_v54 }
  0x5f   :  { %2576 = vmatpush3.bf16.msra.mxu1 %v2575_v5  ;;  %v218_v5 = vld [vmem:[%s4577_s1 + $0x638] sm:$0xff]  ;;  %v2627_v16 = vpack.c.bf16 %v250_v8, %v249_v6  ;;  %v225_v60 = vld [vmem:[%s4577_s1 + $0x670] sm:$0xff] }
  0x60   :  { %2578 = vmatprep.subr.bf16.mxu1 %v2577_v12  ;;  %v236_v12 = vld [vmem:[%s4577_s1 + $0x6c8] sm:$0xff]  ;;  %v2595_v15 = vpack.c.bf16 %v218_v5, %v217_v4  ;;  %v323_v4 = vld [vmem:[%s4577_s1 + $0x980] sm:$0xff]  ;;  %v2611_v6 = vpack.c.bf16 %v226_v62, %v225_v60  ;;  %v314_v62 = vld [vmem:[%s4577_s1 + $0x938] sm:$0xff] }
  0x61   :  { %2548 = vmatpush3.bf16.msra.mxu0 %v2547_v18  ;;  %v2597_v17 = vpack.c.bf16 %v236_v12, %v235_v9  ;;  %v219_v18 = vld [vmem:[%s4577_s1 + $0x640] sm:$0xff]  ;;  %v324_v5 = vld [vmem:[%s4577_s1 + $0x988] sm:$0xff] }
  0x62   :  { %2582 = vmatprep.subr.bf16.mxu0 %v2581_v21  ;;  %v251_v21 = vld [vmem:[%s4577_s1 + $0x740] sm:$0xff]  ;;  %v276_v12 = vld [vmem:[%s4577_s1 + $0x808] sm:$0xff]  ;;  %v2677_v14 = vpack.c.bf16 %v324_v5, %v323_v4 }
  0x63   :  { %2580 = vmatpush3.bf16.msra.mxu1 %v2579_v19  ;;  %v220_v19 = vld [vmem:[%s4577_s1 + $0x648] sm:$0xff]  ;;  %v275_v9 = vld [vmem:[%s4577_s1 + $0x800] sm:$0xff] }
  0x64   :  { %2614 = vmatprep.subr.bf16.mxu1 %v2613_v25  ;;  %1042 = vmatmul.mubr.f32.vlgmr.msra.gmra.mrb[4].mxu0 %v572_v30  ;;  %v238_v25 = vld [vmem:[%s4577_s1 + $0x6d8] sm:$0xff]  ;;  %v2599_v29 = vpack.c.bf16 %v220_v19, %v219_v18  ;;  %v2631_v30 = vpack.c.bf16 %v252_v23, %v251_v21  ;;  %v588_v18 = vrot.slane %v3395_v47, %v3353_v27  ;;  %v325_v19 = vld [vmem:[%s4577_s1 + $0x990] sm:$0xff] }
  0x65   :  { %2584 = vmatpush3.bf16.msra.mxu0 %v2583_v34  ;;  %1181 = vmatprep.mubr.f32.mxu0 %v592_v46  ;;  %v2601_v32 = vpack.c.bf16 %v238_v25, %v237_v24  ;;  %v222_v34 = vld [vmem:[%s4577_s1 + $0x658] sm:$0xff]  ;;  %v223_v46 = vld [vmem:[%s4577_s1 + $0x660] sm:$0xff]  ;;  %v2647_v23 = vpack.c.bf16 %v276_v12, %v275_v9  ;;  %v596_v24 = vrot.slane %v3395_v47, %v3362_v31  ;;  %v316_v12 = vld [vmem:[%s4577_s1 + $0x948] sm:$0xff] }
  0x66   :  { %1112 = vmatmul.mubr.f32.vlgmr.msra.gmra.mrb[4].mxu1 %v580_v35  ;;  %2586 = vmatprep.subr.bf16.mxu0 %v2585_v37  ;;  %v253_v35 = vld [vmem:[%s4577_s1 + $0x750] sm:$0xff]  ;;  %v254_v37 = vld [vmem:[%s4577_s1 + $0x758] sm:$0xff]  ;;  %v2603_v42 = vpack.c.bf16 %v222_v34, %v221_v33  ;;  %v2607_v56 = vpack.c.bf16 %v224_v48, %v223_v46  ;;  %v295_v33 = vld [vmem:[%s4577_s1 + $0x8a0] sm:$0xff] }
  0x67   :  { %2616 = vmatpush3.bf16.msra.mxu1 %v2615_v36  ;;  %1251 = vmatprep.mubr.f32.mxu1 %v600_v50  ;;  %v2633_v36 = vpack.c.bf16 %v270_v28, %v269_v26  ;;  %v2635_v44 = vpack.c.bf16 %v254_v37, %v253_v35  ;;  %v326_v21 = vld [vmem:[%s4577_s1 + $0x998] sm:$0xff]  ;;  %v277_v28 = vld [vmem:[%s4577_s1 + $0x810] sm:$0xff]  ;;  %v296_v34 = vld [vmem:[%s4577_s1 + $0x8a8] sm:$0xff] }
  0x68   :  { %2618 = vmatprep.subr.bf16.mxu1 %v2617_v41  ;;  %v272_v41 = vld [vmem:[%s4577_s1 + $0x7e8] sm:$0xff]  ;;  %v310_v47 = vld [vmem:[%s4577_s1 + $0x918] sm:$0xff] }
  0x69   :  { %2588 = vmatpush3.bf16.msra.mxu0 %v2587_v51  ;;  %v2637_v50 = vpack.c.bf16 %v272_v41, %v271_v40  ;;  %v256_v51 = vld [vmem:[%s4577_s1 + $0x768] sm:$0xff]  ;;  %v2653_v41 = vpack.c.bf16 %v296_v34, %v295_v33 }
  0x6a   :  { %2590 = vmatprep.subr.bf16.mxu0 %v2589_v52  ;;  %v242_v52 = vld [vmem:[%s4577_s1 + $0x6f8] sm:$0xff]  ;;  %v328_v37 = vld [vmem:[%s4577_s1 + $0x9a8] sm:$0xff] }
  0x6b   :  { %2620 = vmatpush3.bf16.msra.mxu1 %v2619_v20  ;;  %v241_v20 = vld [vmem:[%s4577_s1 + $0x6f0] sm:$0xff]  ;;  %v312_v48 = vld [vmem:[%s4577_s1 + $0x928] sm:$0xff] }
  0x6c   :  { %2622 = vmatprep.subr.bf16.mxu1 %v2621_v58  ;;  %v2639_v58 = vpack.c.bf16 %v256_v51, %v255_v49  ;;  %v2609_v59 = vpack.c.bf16 %v242_v52, %v241_v20  ;;  %v297_v49 = vld [vmem:[%s4577_s1 + $0x8b0] sm:$0xff]  ;;  %v330_v20 = vld [vmem:[%s4577_s1 + $0x9b8] sm:$0xff] }
  0x6d   :  { %2592 = vmatpush3.bf16.msra.mxu0 %v2591_v1  ;;  %v258_v1 = vld [vmem:[%s4577_s1 + $0x778] sm:$0xff]  ;;  %v329_v51 = vld [vmem:[%s4577_s1 + $0x9b0] sm:$0xff] }
  0x6e   :  { %2594 = vmatprep.subr.bf16.mxu0 %v2593_v3  ;;  %v292_v3 = vld [vmem:[%s4577_s1 + $0x888] sm:$0xff]  ;;  %v2689_v60 = vpack.c.bf16 %v330_v20, %v329_v51  ;;  %v321_v51 = vld [vmem:[%s4577_s1 + $0x970] sm:$0xff] }
  0x6f   :  { %2624 = vmatpush3.bf16.msra.mxu1 %v2623_v2  ;;  %v291_v2 = vld [vmem:[%s4577_s1 + $0x880] sm:$0xff] }
  0x70   :  { %2626 = vmatprep.subr.bf16.mxu1 %v2625_v7  ;;  %v2643_v7 = vpack.c.bf16 %v258_v1, %v257_v63  ;;  %v2645_v8 = vpack.c.bf16 %v292_v3, %v291_v2  ;;  %v299_v63 = vld [vmem:[%s4577_s1 + $0x8c0] sm:$0xff]  ;;  %v332_v2 = vld [vmem:[%s4577_s1 + $0x9c8] sm:$0xff] }
  0x71   :  { %2596 = vmatpush3.bf16.msra.mxu0 %v2595_v15  ;;  %v308_v15 = vld [vmem:[%s4577_s1 + $0x908] sm:$0xff]  ;;  %v331_v1 = vld [vmem:[%s4577_s1 + $0x9c0] sm:$0xff] }
  0x72   :  { %2598 = vmatprep.subr.bf16.mxu0 %v2597_v17  ;;  %v294_v17 = vld [vmem:[%s4577_s1 + $0x898] sm:$0xff]  ;;  %v2679_v25 = vpack.c.bf16 %v308_v15, %v307_v13  ;;  %v2693_v9 = vpack.c.bf16 %v332_v2, %v331_v1  ;;  %v301_v13 = vld [vmem:[%s4577_s1 + $0x8d0] sm:$0xff]  ;;  %v371_v1 = vld [vmem:[%s4577_s1 + $0xb00] sm:$0xff] }
  0x73   :  { %2628 = vmatpush3.bf16.msra.mxu1 %v2627_v16  ;;  %v293_v16 = vld [vmem:[%s4577_s1 + $0x890] sm:$0xff] }
  0x74   :  { %2630 = vmatprep.subr.bf16.mxu1 %v2629_v22  ;;  %v3798_v22 = vld [vmem:[%s4578_s0 + $0x10] sm:$0xff]  ;;  %v2649_v26 = vpack.c.bf16 %v294_v17, %v293_v16  ;;  %v334_v16 = vld [vmem:[%s4577_s1 + $0x9d8] sm:$0xff] }
  0x75   :  { %2600 = vmatpush3.bf16.msra.mxu0 %v2599_v29  ;;  %v278_v29 = vld [vmem:[%s4577_s1 + $0x818] sm:$0xff]  ;;  %v608_v35 = vrot.slane %v3798_v22, %v3078_v10  ;;  %v616_v61 = vrot.slane %v3798_v22, %v3081_v11  ;;  %v333_v15 = vld [vmem:[%s4577_s1 + $0x9d0] sm:$0xff] }
  0x76   :  { %2602 = vmatprep.subr.bf16.mxu0 %v2601_v32  ;;  %v2681_v32 = vpack.c.bf16 %v326_v21, %v325_v19  ;;  %v2651_v38 = vpack.c.bf16 %v278_v29, %v277_v28  ;;  %v285_v21 = vld [vmem:[%s4577_s1 + $0x850] sm:$0xff]  ;;  %v303_v28 = vld [vmem:[%s4577_s1 + $0x8e0] sm:$0xff]  ;;  %v304_v29 = vld [vmem:[%s4577_s1 + $0x8e8] sm:$0xff] }
  0x77   :  { %2632 = vmatpush3.bf16.msra.mxu1 %v2631_v30  ;;  %v309_v30 = vld [vmem:[%s4577_s1 + $0x910] sm:$0xff]  ;;  %v2669_v34 = vpack.c.bf16 %v304_v29, %v303_v28  ;;  %v632_v28 = vrot.slane %v3798_v22, %v3182_v57 }
  0x78   :  { %2634 = vmatprep.subr.bf16.mxu1 %v2633_v36  ;;  %v327_v36 = vld [vmem:[%s4577_s1 + $0x9a0] sm:$0xff]  ;;  %v2683_v40 = vpack.c.bf16 %v310_v47, %v309_v30 }
  0x79   :  { %2604 = vmatpush3.bf16.msra.mxu0 %v2603_v42  ;;  %v279_v42 = vld [vmem:[%s4577_s1 + $0x820] sm:$0xff]  ;;  %v2685_v46 = vpack.c.bf16 %v328_v37, %v327_v36  ;;  %v288_v36 = vld [vmem:[%s4577_s1 + $0x868] sm:$0xff] }
  0x7a   :  { %2606 = vmatprep.subr.bf16.mxu0 %v2605_v45  ;;  %v311_v45 = vld [vmem:[%s4577_s1 + $0x920] sm:$0xff] }
  0x7b   :  { %2636 = vmatpush3.bf16.msra.mxu1 %v2635_v44  ;;  %v280_v44 = vld [vmem:[%s4577_s1 + $0x828] sm:$0xff]  ;;  %v2687_v54 = vpack.c.bf16 %v312_v48, %v311_v45  ;;  %v335_v30 = vld [vmem:[%s4577_s1 + $0x9e0] sm:$0xff] }
  0x7c   :  { %2638 = vmatprep.subr.bf16.mxu1 %v2637_v50  ;;  %v298_v50 = vld [vmem:[%s4577_s1 + $0x8b8] sm:$0xff]  ;;  %v2655_v52 = vpack.c.bf16 %v280_v44, %v279_v42  ;;  %v319_v37 = vld [vmem:[%s4577_s1 + $0x960] sm:$0xff]  ;;  %v337_v42 = vld [vmem:[%s4577_s1 + $0x9f0] sm:$0xff] }
  0x7d   :  { %2608 = vmatpush3.bf16.msra.mxu0 %v2607_v56  ;;  %v2657_v55 = vpack.c.bf16 %v298_v50, %v297_v49  ;;  %v281_v56 = vld [vmem:[%s4577_s1 + $0x830] sm:$0xff]  ;;  %v338_v44 = vld [vmem:[%s4577_s1 + $0x9f8] sm:$0xff] }
  0x7e   :  { %2610 = vmatprep.subr.bf16.mxu0 %v2609_v59  ;;  %v313_v59 = vld [vmem:[%s4577_s1 + $0x930] sm:$0xff]  ;;  %v290_v50 = vld [vmem:[%s4577_s1 + $0x878] sm:$0xff]  ;;  %v2705_v20 = vpack.c.bf16 %v338_v44, %v337_v42 }
  0x7f   :  { %2640 = vmatpush3.bf16.msra.mxu1 %v2639_v58  ;;  %v282_v58 = vld [vmem:[%s4577_s1 + $0x838] sm:$0xff]  ;;  %v2691_v4 = vpack.c.bf16 %v314_v62, %v313_v59  ;;  %v289_v49 = vld [vmem:[%s4577_s1 + $0x870] sm:$0xff] }
  0x80   :  { %2642 = vmatprep.subr.bf16.mxu1 %v2641_v0  ;;  %v300_v0 = vld [vmem:[%s4577_s1 + $0x8c8] sm:$0xff]  ;;  %v2659_v3 = vpack.c.bf16 %v282_v58, %v281_v56  ;;  %v387_v56 = vld [vmem:[%s4577_s1 + $0xb80] sm:$0xff]  ;;  %v2675_v59 = vpack.c.bf16 %v290_v50, %v289_v49  ;;  %v378_v50 = vld [vmem:[%s4577_s1 + $0xb38] sm:$0xff] }
  0x81   :  { %2612 = vmatpush3.bf16.msra.mxu0 %v2611_v6  ;;  %v2661_v5 = vpack.c.bf16 %v300_v0, %v299_v63  ;;  %v283_v6 = vld [vmem:[%s4577_s1 + $0x840] sm:$0xff]  ;;  %v388_v58 = vld [vmem:[%s4577_s1 + $0xb88] sm:$0xff] }
  0x82   :  { %2646 = vmatprep.subr.bf16.mxu0 %v2645_v8  ;;  %v315_v8 = vld [vmem:[%s4577_s1 + $0x940] sm:$0xff]  ;;  %v340_v0 = vld [vmem:[%s4577_s1 + $0xa08] sm:$0xff]  ;;  %v2741_v2 = vpack.c.bf16 %v388_v58, %v387_v56 }
  0x83   :  { %2644 = vmatpush3.bf16.msra.mxu1 %v2643_v7  ;;  %v284_v7 = vld [vmem:[%s4577_s1 + $0x848] sm:$0xff]  ;;  %v339_v63 = vld [vmem:[%s4577_s1 + $0xa00] sm:$0xff] }
  0x84   :  { %2678 = vmatprep.subr.bf16.mxu1 %v2677_v14  ;;  %1182 = vmatmul.mubr.f32.vlgmr.msra.gmra.mrb[6].mxu0 %v588_v18  ;;  %v302_v14 = vld [vmem:[%s4577_s1 + $0x8d8] sm:$0xff]  ;;  %v2663_v17 = vpack.c.bf16 %v284_v7, %v283_v6  ;;  %v2695_v18 = vpack.c.bf16 %v316_v12, %v315_v8  ;;  %v604_v6 = vrot.slane %v3798_v22, %v3141_v39  ;;  %v389_v7 = vld [vmem:[%s4577_s1 + $0xb90] sm:$0xff] }
  0x85   :  { %2648 = vmatpush3.bf16.msra.mxu0 %v2647_v23  ;;  %1321 = vmatprep.mubr.f32.mxu0 %v608_v35  ;;  %v2665_v19 = vpack.c.bf16 %v302_v14, %v301_v13  ;;  %v286_v23 = vld [vmem:[%s4577_s1 + $0x858] sm:$0xff]  ;;  %v287_v35 = vld [vmem:[%s4577_s1 + $0x860] sm:$0xff]  ;;  %v612_v12 = vrot.slane %v3798_v22, %v3150_v43 }
  0x86   :  { %1252 = vmatmul.mubr.f32.vlgmr.msra.gmra.mrb[6].mxu1 %v596_v24  ;;  %2650 = vmatprep.subr.bf16.mxu0 %v2649_v26  ;;  %v317_v24 = vld [vmem:[%s4577_s1 + $0x950] sm:$0xff]  ;;  %v318_v26 = vld [vmem:[%s4577_s1 + $0x958] sm:$0xff]  ;;  %v2667_v47 = vpack.c.bf16 %v286_v23, %v285_v21  ;;  %v2671_v45 = vpack.c.bf16 %v288_v36, %v287_v35  ;;  %v359_v21 = vld [vmem:[%s4577_s1 + $0xaa0] sm:$0xff] }
  0x87   :  { %2680 = vmatpush3.bf16.msra.mxu1 %v2679_v25  ;;  %1391 = vmatprep.mubr.f32.mxu1 %v616_v61  ;;  %v2697_v25 = vpack.c.bf16 %v334_v16, %v333_v15  ;;  %v2699_v33 = vpack.c.bf16 %v318_v26, %v317_v24  ;;  %v390_v8 = vld [vmem:[%s4577_s1 + $0xb98] sm:$0xff]  ;;  %v341_v15 = vld [vmem:[%s4577_s1 + $0xa10] sm:$0xff]  ;;  %v360_v23 = vld [vmem:[%s4577_s1 + $0xaa8] sm:$0xff]  ;;  %v624_v24 = vrot.slane %v3798_v22, %v3171_v53 }
  0x88   :  { %2682 = vmatprep.subr.bf16.mxu1 %v2681_v32  ;;  %v336_v32 = vld [vmem:[%s4577_s1 + $0x9e8] sm:$0xff]  ;;  %v342_v16 = vld [vmem:[%s4577_s1 + $0xa18] sm:$0xff] }
  0x89   :  { %2652 = vmatpush3.bf16.msra.mxu0 %v2651_v38  ;;  %v2701_v61 = vpack.c.bf16 %v336_v32, %v335_v30  ;;  %v320_v38 = vld [vmem:[%s4577_s1 + $0x968] sm:$0xff]  ;;  %v2715_v29 = vpack.c.bf16 %v342_v16, %v341_v15  ;;  %v2717_v32 = vpack.c.bf16 %v360_v23, %v359_v21  ;;  %v367_v15 = vld [vmem:[%s4577_s1 + $0xae0] sm:$0xff] }
  0x8a   :  { %2654 = vmatprep.subr.bf16.mxu0 %v2653_v41  ;;  %v306_v41 = vld [vmem:[%s4577_s1 + $0x8f8] sm:$0xff]  ;;  %v392_v26 = vld [vmem:[%s4577_s1 + $0xba8] sm:$0xff] }
  0x8b   :  { %2684 = vmatpush3.bf16.msra.mxu1 %v2683_v40  ;;  %v305_v40 = vld [vmem:[%s4577_s1 + $0x8f0] sm:$0xff]  ;;  %v376_v36 = vld [vmem:[%s4577_s1 + $0xb28] sm:$0xff] }
  0x8c   :  { %2686 = vmatprep.subr.bf16.mxu1 %v2685_v46  ;;  %v2703_v46 = vpack.c.bf16 %v320_v38, %v319_v37  ;;  %v2673_v48 = vpack.c.bf16 %v306_v41, %v305_v40  ;;  %v361_v37 = vld [vmem:[%s4577_s1 + $0xab0] sm:$0xff]  ;;  %v394_v40 = vld [vmem:[%s4577_s1 + $0xbb8] sm:$0xff]  ;;  %v368_v16 = vld [vmem:[%s4577_s1 + $0xae8] sm:$0xff] }
  0x8d   :  { %2656 = vmatpush3.bf16.msra.mxu0 %v2655_v52  ;;  %v322_v52 = vld [vmem:[%s4577_s1 + $0x978] sm:$0xff]  ;;  %v393_v38 = vld [vmem:[%s4577_s1 + $0xbb0] sm:$0xff]  ;;  %v2733_v23 = vpack.c.bf16 %v368_v16, %v367_v15 }
  0x8e   :  { %2658 = vmatprep.subr.bf16.mxu0 %v2657_v55  ;;  %v356_v55 = vld [vmem:[%s4577_s1 + $0xa88] sm:$0xff]  ;;  %v2753_v49 = vpack.c.bf16 %v394_v40, %v393_v38  ;;  %v385_v38 = vld [vmem:[%s4577_s1 + $0xb70] sm:$0xff] }
  0x8f   :  { %2688 = vmatpush3.bf16.msra.mxu1 %v2687_v54  ;;  %v355_v54 = vld [vmem:[%s4577_s1 + $0xa80] sm:$0xff] }
  0x90   :  { %2690 = vmatprep.subr.bf16.mxu1 %v2689_v60  ;;  %v2707_v60 = vpack.c.bf16 %v322_v52, %v321_v51  ;;  %v2709_v62 = vpack.c.bf16 %v356_v55, %v355_v54  ;;  %v363_v51 = vld [vmem:[%s4577_s1 + $0xac0] sm:$0xff]  ;;  %v396_v54 = vld [vmem:[%s4577_s1 + $0xbc8] sm:$0xff] }
  0x91   :  { %2660 = vmatpush3.bf16.msra.mxu0 %v2659_v3  ;;  %v372_v3 = vld [vmem:[%s4577_s1 + $0xb08] sm:$0xff]  ;;  %v395_v52 = vld [vmem:[%s4577_s1 + $0xbc0] sm:$0xff] }
  0x92   :  { %2662 = vmatprep.subr.bf16.mxu0 %v2661_v5  ;;  %v358_v5 = vld [vmem:[%s4577_s1 + $0xa98] sm:$0xff]  ;;  %v2743_v13 = vpack.c.bf16 %v372_v3, %v371_v1  ;;  %v365_v1 = vld [vmem:[%s4577_s1 + $0xad0] sm:$0xff] }
  0x93   :  { %2692 = vmatpush3.bf16.msra.mxu1 %v2691_v4  ;;  %v357_v4 = vld [vmem:[%s4577_s1 + $0xa90] sm:$0xff] }
  0x94   :  { %2694 = vmatprep.subr.bf16.mxu1 %v2693_v9  ;;  %v2711_v9 = vpack.c.bf16 %v340_v0, %v339_v63  ;;  %v2713_v14 = vpack.c.bf16 %v358_v5, %v357_v4  ;;  %v2757_v63 = vpack.c.bf16 %v396_v54, %v395_v52  ;;  %v380_v0 = vld [vmem:[%s4577_s1 + $0xb48] sm:$0xff]  ;;  %v397_v3 = vld [vmem:[%s4577_s1 + $0xbd0] sm:$0xff]  ;;  %v398_v4 = vld [vmem:[%s4577_s1 + $0xbd8] sm:$0xff] }
  0x95   :  { %2664 = vmatpush3.bf16.msra.mxu0 %v2663_v17  ;;  %v373_v17 = vld [vmem:[%s4577_s1 + $0xb10] sm:$0xff]  ;;  %v435_v52 = vld [vmem:[%s4577_s1 + $0xd00] sm:$0xff] }
  0x96   :  { %2666 = vmatprep.subr.bf16.mxu0 %v2665_v19  ;;  %v374_v19 = vld [vmem:[%s4577_s1 + $0xb18] sm:$0xff] }
  0x97   :  { %2696 = vmatpush3.bf16.msra.mxu1 %v2695_v18  ;;  %v2745_v18 = vpack.c.bf16 %v390_v8, %v389_v7  ;;  %v2747_v30 = vpack.c.bf16 %v374_v19, %v373_v17  ;;  %v349_v8 = vld [vmem:[%s4577_s1 + $0xa50] sm:$0xff]  ;;  %v399_v17 = vld [vmem:[%s4577_s1 + $0xbe0] sm:$0xff] }
  0x98   :  { %2698 = vmatprep.subr.bf16.mxu1 %v2697_v25  ;;  %v391_v25 = vld [vmem:[%s4577_s1 + $0xba0] sm:$0xff] }
  0x99   :  { %2668 = vmatpush3.bf16.msra.mxu0 %v2667_v47  ;;  %v343_v47 = vld [vmem:[%s4577_s1 + $0xa20] sm:$0xff]  ;;  %v2749_v35 = vpack.c.bf16 %v392_v26, %v391_v25  ;;  %v352_v25 = vld [vmem:[%s4577_s1 + $0xa68] sm:$0xff] }
  0x9a   :  { %2670 = vmatprep.subr.bf16.mxu0 %v2669_v34  ;;  %v375_v34 = vld [vmem:[%s4577_s1 + $0xb20] sm:$0xff] }
  0x9b   :  { %2700 = vmatpush3.bf16.msra.mxu1 %v2699_v33  ;;  %v344_v33 = vld [vmem:[%s4577_s1 + $0xa28] sm:$0xff]  ;;  %v2751_v42 = vpack.c.bf16 %v376_v36, %v375_v34  ;;  %v383_v26 = vld [vmem:[%s4577_s1 + $0xb60] sm:$0xff] }
  0x9c   :  { %2702 = vmatprep.subr.bf16.mxu1 %v2701_v61  ;;  %v362_v61 = vld [vmem:[%s4577_s1 + $0xab8] sm:$0xff]  ;;  %v2719_v41 = vpack.c.bf16 %v344_v33, %v343_v47  ;;  %v401_v47 = vld [vmem:[%s4577_s1 + $0xbf0] sm:$0xff] }
  0x9d   :  { %2672 = vmatpush3.bf16.msra.mxu0 %v2671_v45  ;;  %v2721_v44 = vpack.c.bf16 %v362_v61, %v361_v37  ;;  %v345_v45 = vld [vmem:[%s4577_s1 + $0xa30] sm:$0xff]  ;;  %v402_v33 = vld [vmem:[%s4577_s1 + $0xbf8] sm:$0xff] }
  0x9e   :  { %2674 = vmatprep.subr.bf16.mxu0 %v2673_v48  ;;  %v377_v48 = vld [vmem:[%s4577_s1 + $0xb30] sm:$0xff]  ;;  %v354_v61 = vld [vmem:[%s4577_s1 + $0xa78] sm:$0xff]  ;;  %v2769_v40 = vpack.c.bf16 %v402_v33, %v401_v47 }
  0x9f   :  { %2704 = vmatpush3.bf16.msra.mxu1 %v2703_v46  ;;  %v346_v46 = vld [vmem:[%s4577_s1 + $0xa38] sm:$0xff]  ;;  %v2755_v56 = vpack.c.bf16 %v378_v50, %v377_v48  ;;  %v353_v37 = vld [vmem:[%s4577_s1 + $0xa70] sm:$0xff] }
  0xa0   :  { %2706 = vmatprep.subr.bf16.mxu1 %v2705_v20  ;;  %v364_v20 = vld [vmem:[%s4577_s1 + $0xac8] sm:$0xff]  ;;  %v2723_v55 = vpack.c.bf16 %v346_v46, %v345_v45  ;;  %v451_v45 = vld [vmem:[%s4577_s1 + $0xd80] sm:$0xff]  ;;  %v2739_v48 = vpack.c.bf16 %v354_v61, %v353_v37  ;;  %v409_v47 = vld [vmem:[%s4577_s1 + $0xc30] sm:$0xff] }
  0xa1   :  { %2676 = vmatpush3.bf16.msra.mxu0 %v2675_v59  ;;  %v2725_v58 = vpack.c.bf16 %v364_v20, %v363_v51  ;;  %v347_v59 = vld [vmem:[%s4577_s1 + $0xa40] sm:$0xff]  ;;  %v452_v46 = vld [vmem:[%s4577_s1 + $0xd88] sm:$0xff]  ;;  %v410_v33 = vld [vmem:[%s4577_s1 + $0xc38] sm:$0xff] }
  0xa2   :  { %2710 = vmatprep.subr.bf16.mxu0 %v2709_v62  ;;  %v379_v62 = vld [vmem:[%s4577_s1 + $0xb40] sm:$0xff]  ;;  %v404_v20 = vld [vmem:[%s4577_s1 + $0xc08] sm:$0xff]  ;;  %v2805_v54 = vpack.c.bf16 %v452_v46, %v451_v45 }
  0xa3   :  { %2708 = vmatpush3.bf16.msra.mxu1 %v2707_v60  ;;  %v348_v60 = vld [vmem:[%s4577_s1 + $0xa48] sm:$0xff]  ;;  %v403_v51 = vld [vmem:[%s4577_s1 + $0xc00] sm:$0xff] }
  0xa4   :  { %2742 = vmatprep.subr.bf16.mxu1 %v2741_v2  ;;  %1322 = vmatmul.mubr.f32.vlgmr.msra.gmra.mrb[8].mxu0 %v604_v6  ;;  %v366_v2 = vld [vmem:[%s4577_s1 + $0xad8] sm:$0xff]  ;;  %v2727_v5 = vpack.c.bf16 %v348_v60, %v347_v59  ;;  %v2759_v6 = vpack.c.bf16 %v380_v0, %v379_v62  ;;  %v620_v59 = vrot.slane %v3798_v22, %v3353_v27  ;;  %v453_v60 = vld [vmem:[%s4577_s1 + $0xd90] sm:$0xff]  ;;  %v427_v37 = vld [vmem:[%s4577_s1 + $0xcc0] sm:$0xff] }
  0xa5   :  { %2712 = vmatpush3.bf16.msra.mxu0 %v2711_v9  ;;  %1461 = vmatprep.mubr.f32.mxu0 %v624_v24  ;;  %v2729_v7 = vpack.c.bf16 %v366_v2, %v365_v1  ;;  %v350_v9 = vld [vmem:[%s4577_s1 + $0xa58] sm:$0xff]  ;;  %v351_v24 = vld [vmem:[%s4577_s1 + $0xa60] sm:$0xff]  ;;  %v2775_v0 = vpack.c.bf16 %v404_v20, %v403_v51  ;;  %v628_v1 = vrot.slane %v3798_v22, %v3362_v31  ;;  %v428_v61 = vld [vmem:[%s4577_s1 + $0xcc8] sm:$0xff] }
  0xa6   :  { %1392 = vmatmul.mubr.f32.vlgmr.msra.gmra.mrb[8].mxu1 %v612_v12  ;;  %2714 = vmatprep.subr.bf16.mxu0 %v2713_v14  ;;  %v381_v12 = vld [vmem:[%s4577_s1 + $0xb50] sm:$0xff]  ;;  %v382_v14 = vld [vmem:[%s4577_s1 + $0xb58] sm:$0xff]  ;;  %v2731_v19 = vpack.c.bf16 %v350_v9, %v349_v8  ;;  %v2735_v34 = vpack.c.bf16 %v352_v25, %v351_v24  ;;  %v423_v8 = vld [vmem:[%s4577_s1 + $0xca0] sm:$0xff] }
  0xa7   :  { %2744 = vmatpush3.bf16.msra.mxu1 %v2743_v13  ;;  %1531 = vmatprep.mubr.f32.mxu1 %v632_v28  ;;  %v2761_v13 = vpack.c.bf16 %v398_v4, %v397_v3  ;;  %v2763_v21 = vpack.c.bf16 %v382_v14, %v381_v12  ;;  %v454_v62 = vld [vmem:[%s4577_s1 + $0xd98] sm:$0xff]  ;;  %v405_v4 = vld [vmem:[%s4577_s1 + $0xc10] sm:$0xff]  ;;  %v424_v9 = vld [vmem:[%s4577_s1 + $0xca8] sm:$0xff] }
  0xa8   :  { %2746 = vmatprep.subr.bf16.mxu1 %v2745_v18  ;;  %v400_v18 = vld [vmem:[%s4577_s1 + $0xbe8] sm:$0xff]  ;;  %v438_v22 = vld [vmem:[%s4577_s1 + $0xd18] sm:$0xff]  ;;  %v425_v24 = vld [vmem:[%s4577_s1 + $0xcb0] sm:$0xff] }
  0xa9   :  { %2716 = vmatpush3.bf16.msra.mxu0 %v2715_v29  ;;  %v2765_v28 = vpack.c.bf16 %v400_v18, %v399_v17  ;;  %v384_v29 = vld [vmem:[%s4577_s1 + $0xb68] sm:$0xff]  ;;  %v2781_v18 = vpack.c.bf16 %v424_v9, %v423_v8  ;;  %v426_v25 = vld [vmem:[%s4577_s1 + $0xcb8] sm:$0xff]  ;;  %v411_v45 = vld [vmem:[%s4577_s1 + $0xc40] sm:$0xff] }
  0xaa   :  { %2718 = vmatprep.subr.bf16.mxu0 %v2717_v32  ;;  %v370_v32 = vld [vmem:[%s4577_s1 + $0xaf8] sm:$0xff]  ;;  %v456_v14 = vld [vmem:[%s4577_s1 + $0xda8] sm:$0xff]  ;;  %v429_v51 = vld [vmem:[%s4577_s1 + $0xcd0] sm:$0xff] }
  0xab   :  { %2748 = vmatpush3.bf16.msra.mxu1 %v2747_v30  ;;  %v369_v30 = vld [vmem:[%s4577_s1 + $0xaf0] sm:$0xff]  ;;  %v412_v46 = vld [vmem:[%s4577_s1 + $0xc48] sm:$0xff]  ;;  %v430_v20 = vld [vmem:[%s4577_s1 + $0xcd8] sm:$0xff] }
  0xac   :  { %2750 = vmatprep.subr.bf16.mxu1 %v2749_v35  ;;  %v2767_v35 = vpack.c.bf16 %v384_v29, %v383_v26  ;;  %v2737_v36 = vpack.c.bf16 %v370_v32, %v369_v30  ;;  %v457_v26 = vld [vmem:[%s4577_s1 + $0xdb0] sm:$0xff]  ;;  %v2785_v32 = vpack.c.bf16 %v426_v25, %v425_v24  ;;  %v415_v8 = vld [vmem:[%s4577_s1 + $0xc60] sm:$0xff]  ;;  %v416_v9 = vld [vmem:[%s4577_s1 + $0xc68] sm:$0xff] }
  0xad   :  { %2720 = vmatpush3.bf16.msra.mxu0 %v2719_v41  ;;  %v386_v41 = vld [vmem:[%s4577_s1 + $0xb78] sm:$0xff]  ;;  %v449_v24 = vld [vmem:[%s4577_s1 + $0xd70] sm:$0xff] }
  0xae   :  { %2722 = vmatprep.subr.bf16.mxu0 %v2721_v44  ;;  %v420_v44 = vld [vmem:[%s4577_s1 + $0xc88] sm:$0xff] }
  0xaf   :  { %2752 = vmatpush3.bf16.msra.mxu1 %v2751_v42  ;;  %v419_v42 = vld [vmem:[%s4577_s1 + $0xc80] sm:$0xff] }
  0xb0   :  { %2754 = vmatprep.subr.bf16.mxu1 %v2753_v49  ;;  %v2771_v49 = vpack.c.bf16 %v386_v41, %v385_v38  ;;  %v2773_v50 = vpack.c.bf16 %v420_v44, %v419_v42  ;;  %v459_v38 = vld [vmem:[%s4577_s1 + $0xdc0] sm:$0xff]  ;;  %v2787_v41 = vpack.c.bf16 %v410_v33, %v409_v47  ;;  %v2789_v44 = vpack.c.bf16 %v428_v61, %v427_v37 }
  0xb1   :  { %2724 = vmatpush3.bf16.msra.mxu0 %v2723_v55  ;;  %v436_v55 = vld [vmem:[%s4577_s1 + $0xd08] sm:$0xff]  ;;  %v499_v37 = vld [vmem:[%s4577_s1 + $0xf00] sm:$0xff] }
  0xb2   :  { %2726 = vmatprep.subr.bf16.mxu0 %v2725_v58  ;;  %v422_v58 = vld [vmem:[%s4577_s1 + $0xc98] sm:$0xff]  ;;  %v2807_v2 = vpack.c.bf16 %v436_v55, %v435_v52  ;;  %v461_v52 = vld [vmem:[%s4577_s1 + $0xdd0] sm:$0xff]  ;;  %v2791_v55 = vpack.c.bf16 %v412_v46, %v411_v45 }
  0xb3   :  { %2756 = vmatpush3.bf16.msra.mxu1 %v2755_v56  ;;  %v421_v56 = vld [vmem:[%s4577_s1 + $0xc90] sm:$0xff]  ;;  %v518_v45 = vld [vmem:[%s4577_s1 + $0xf98] sm:$0xff] }
  0xb4   :  { %2758 = vmatprep.subr.bf16.mxu1 %v2757_v63  ;;  %v4203_v63 = vld [vmem:[%s4578_s0 + $0x18] sm:$0xff]  ;;  %v2777_v3 = vpack.c.bf16 %v422_v58, %v421_v56  ;;  %v2793_v58 = vpack.c.bf16 %v430_v20, %v429_v51  ;;  %v501_v20 = vld [vmem:[%s4577_s1 + $0xf10] sm:$0xff] }
  0xb5   :  { %2728 = vmatpush3.bf16.msra.mxu0 %v2727_v5  ;;  %v406_v5 = vld [vmem:[%s4577_s1 + $0xc18] sm:$0xff]  ;;  %v640_v12 = vrot.slane %v4203_v63, %v3078_v10  ;;  %v648_v15 = vrot.slane %v4203_v63, %v3081_v11  ;;  %v407_v10 = vld [vmem:[%s4577_s1 + $0xc20] sm:$0xff] }
  0xb6   :  { %2730 = vmatprep.subr.bf16.mxu0 %v2729_v7  ;;  %v2809_v7 = vpack.c.bf16 %v454_v62, %v453_v60  ;;  %v2779_v16 = vpack.c.bf16 %v406_v5, %v405_v4  ;;  %v414_v60 = vld [vmem:[%s4577_s1 + $0xc58] sm:$0xff]  ;;  %v445_v62 = vld [vmem:[%s4577_s1 + $0xd50] sm:$0xff]  ;;  %v463_v4 = vld [vmem:[%s4577_s1 + $0xde0] sm:$0xff] }
  0xb7   :  { %2760 = vmatpush3.bf16.msra.mxu1 %v2759_v6  ;;  %v437_v6 = vld [vmem:[%s4577_s1 + $0xd10] sm:$0xff]  ;;  %v464_v5 = vld [vmem:[%s4577_s1 + $0xde8] sm:$0xff]  ;;  %v470_v51 = vld [vmem:[%s4577_s1 + $0xe18] sm:$0xff] }
  0xb8   :  { %2762 = vmatprep.subr.bf16.mxu1 %v2761_v13  ;;  %v455_v13 = vld [vmem:[%s4577_s1 + $0xda0] sm:$0xff]  ;;  %v2811_v17 = vpack.c.bf16 %v438_v22, %v437_v6 }
  0xb9   :  { %2732 = vmatpush3.bf16.msra.mxu0 %v2731_v19  ;;  %v408_v19 = vld [vmem:[%s4577_s1 + $0xc28] sm:$0xff]  ;;  %v2813_v11 = vpack.c.bf16 %v456_v14, %v455_v13  ;;  %v2829_v13 = vpack.c.bf16 %v464_v5, %v463_v4  ;;  %v489_v5 = vld [vmem:[%s4577_s1 + $0xeb0] sm:$0xff] }
  0xba   :  { %2734 = vmatprep.subr.bf16.mxu0 %v2733_v23  ;;  %v440_v23 = vld [vmem:[%s4577_s1 + $0xd28] sm:$0xff]  ;;  %v2783_v29 = vpack.c.bf16 %v408_v19, %v407_v10  ;;  %v2799_v10 = vpack.c.bf16 %v416_v9, %v415_v8 }
  0xbb   :  { %2764 = vmatpush3.bf16.msra.mxu1 %v2763_v21  ;;  %v439_v21 = vld [vmem:[%s4577_s1 + $0xd20] sm:$0xff]  ;;  %v448_v14 = vld [vmem:[%s4577_s1 + $0xd68] sm:$0xff] }
  0xbc   :  { %2766 = vmatprep.subr.bf16.mxu1 %v2765_v28  ;;  %v458_v28 = vld [vmem:[%s4577_s1 + $0xdb8] sm:$0xff]  ;;  %v2815_v30 = vpack.c.bf16 %v440_v23, %v439_v21  ;;  %v504_v4 = vld [vmem:[%s4577_s1 + $0xf28] sm:$0xff] }
  0xbd   :  { %2736 = vmatpush3.bf16.msra.mxu0 %v2735_v34  ;;  %v441_v34 = vld [vmem:[%s4577_s1 + $0xd30] sm:$0xff]  ;;  %v418_v23 = vld [vmem:[%s4577_s1 + $0xc78] sm:$0xff] }
  0xbe   :  { %2738 = vmatprep.subr.bf16.mxu0 %v2737_v36  ;;  %v442_v36 = vld [vmem:[%s4577_s1 + $0xd38] sm:$0xff] }
  0xbf   :  { %2768 = vmatpush3.bf16.msra.mxu1 %v2767_v35  ;;  %v2817_v35 = vpack.c.bf16 %v458_v28, %v457_v26  ;;  %v2819_v42 = vpack.c.bf16 %v442_v36, %v441_v34  ;;  %v450_v26 = vld [vmem:[%s4577_s1 + $0xd78] sm:$0xff]  ;;  %v483_v28 = vld [vmem:[%s4577_s1 + $0xe80] sm:$0xff]  ;;  %v468_v36 = vld [vmem:[%s4577_s1 + $0xe08] sm:$0xff] }
  0xc0   :  { %2770 = vmatprep.subr.bf16.mxu1 %v2769_v40  ;;  %v460_v40 = vld [vmem:[%s4577_s1 + $0xdc8] sm:$0xff]  ;;  %v2835_v33 = vpack.c.bf16 %v450_v26, %v449_v24 }
  0xc1   :  { %2740 = vmatpush3.bf16.msra.mxu0 %v2739_v48  ;;  %v443_v48 = vld [vmem:[%s4577_s1 + $0xd40] sm:$0xff]  ;;  %v476_v26 = vld [vmem:[%s4577_s1 + $0xe48] sm:$0xff] }
  0xc2   :  { %2774 = vmatprep.subr.bf16.mxu0 %v2773_v50  ;;  %v444_v50 = vld [vmem:[%s4577_s1 + $0xd48] sm:$0xff] }
  0xc3   :  { %2772 = vmatpush3.bf16.msra.mxu1 %v2771_v49  ;;  %v2821_v49 = vpack.c.bf16 %v460_v40, %v459_v38  ;;  %v2823_v56 = vpack.c.bf16 %v444_v50, %v443_v48  ;;  %v500_v38 = vld [vmem:[%s4577_s1 + $0xf08] sm:$0xff]  ;;  %v485_v40 = vld [vmem:[%s4577_s1 + $0xe90] sm:$0xff]  ;;  %v644_v48 = vrot.slane %v4203_v63, %v3150_v43  ;;  %v502_v43 = vld [vmem:[%s4577_s1 + $0xf18] sm:$0xff] }
  0xc4   :  { %2806 = vmatprep.subr.bf16.mxu1 %v2805_v54  ;;  %1462 = vmatmul.mubr.f32.vlgmr.msra.gmra.mrb[10].mxu0 %v620_v59  ;;  %v462_v54 = vld [vmem:[%s4577_s1 + $0xdd8] sm:$0xff]  ;;  %v413_v59 = vld [vmem:[%s4577_s1 + $0xc50] sm:$0xff] }
  0xc5   :  { %2776 = vmatpush3.bf16.msra.mxu0 %v2775_v0  ;;  %1601 = vmatprep.mubr.f32.mxu0 %v640_v12  ;;  %v2825_v0 = vpack.c.bf16 %v462_v54, %v461_v52  ;;  %v2795_v6 = vpack.c.bf16 %v414_v60, %v413_v59  ;;  %v447_v12 = vld [vmem:[%s4577_s1 + $0xd60] sm:$0xff]  ;;  %v520_v59 = vld [vmem:[%s4577_s1 + $0xfa8] sm:$0xff]  ;;  %v664_v60 = vrot.slane %v4203_v63, %v3182_v57 }
  0xc6   :  { %1532 = vmatmul.mubr.f32.vlgmr.msra.gmra.mrb[10].mxu1 %v628_v1  ;;  %2778 = vmatprep.subr.bf16.mxu0 %v2777_v3  ;;  %v446_v1 = vld [vmem:[%s4577_s1 + $0xd58] sm:$0xff]  ;;  %v432_v3 = vld [vmem:[%s4577_s1 + $0xce8] sm:$0xff]  ;;  %v2831_v19 = vpack.c.bf16 %v448_v14, %v447_v12  ;;  %v487_v54 = vld [vmem:[%s4577_s1 + $0xea0] sm:$0xff] }
  0xc7   :  { %2808 = vmatpush3.bf16.msra.mxu1 %v2807_v2  ;;  %1671 = vmatprep.mubr.f32.mxu1 %v648_v15  ;;  %v431_v2 = vld [vmem:[%s4577_s1 + $0xce0] sm:$0xff]  ;;  %v433_v15 = vld [vmem:[%s4577_s1 + $0xcf0] sm:$0xff]  ;;  %v474_v14 = vld [vmem:[%s4577_s1 + $0xe38] sm:$0xff] }
  0xc8   :  { %2810 = vmatprep.subr.bf16.mxu1 %v2809_v7  ;;  %v2827_v7 = vpack.c.bf16 %v446_v1, %v445_v62  ;;  %v2797_v22 = vpack.c.bf16 %v432_v3, %v431_v2  ;;  %v472_v2 = vld [vmem:[%s4577_s1 + $0xe28] sm:$0xff]  ;;  %v503_v3 = vld [vmem:[%s4577_s1 + $0xf20] sm:$0xff] }
  0xc9   :  { %2780 = vmatpush3.bf16.msra.mxu0 %v2779_v16  ;;  %v434_v16 = vld [vmem:[%s4577_s1 + $0xcf8] sm:$0xff]  ;;  %v2879_v9 = vpack.c.bf16 %v504_v4, %v503_v3 }
  0xca   :  { %2782 = vmatprep.subr.bf16.mxu0 %v2781_v18  ;;  %v466_v18 = vld [vmem:[%s4577_s1 + $0xdf8] sm:$0xff]  ;;  %v2801_v21 = vpack.c.bf16 %v434_v16, %v433_v15  ;;  %v505_v15 = vld [vmem:[%s4577_s1 + $0xf30] sm:$0xff] }
  0xcb   :  { %2812 = vmatpush3.bf16.msra.mxu1 %v2811_v17  ;;  %v465_v17 = vld [vmem:[%s4577_s1 + $0xdf0] sm:$0xff] }
  0xcc   :  { %2814 = vmatprep.subr.bf16.mxu1 %v2813_v11  ;;  %v417_v11 = vld [vmem:[%s4577_s1 + $0xc70] sm:$0xff]  ;;  %v2833_v25 = vpack.c.bf16 %v466_v18, %v465_v17  ;;  %v506_v17 = vld [vmem:[%s4577_s1 + $0xf38] sm:$0xff]  ;;  %v491_v18 = vld [vmem:[%s4577_s1 + $0xec0] sm:$0xff] }
  0xcd   :  { %2784 = vmatpush3.bf16.msra.mxu0 %v2783_v29  ;;  %v484_v29 = vld [vmem:[%s4577_s1 + $0xe88] sm:$0xff]  ;;  %v2803_v47 = vpack.c.bf16 %v418_v23, %v417_v11  ;;  %v2883_v23 = vpack.c.bf16 %v506_v17, %v505_v15  ;;  %v660_v17 = vrot.slane %v4203_v63, %v3362_v31 }
  0xce   :  { %2786 = vmatprep.subr.bf16.mxu0 %v2785_v32  ;;  %v516_v32 = vld [vmem:[%s4577_s1 + $0xf88] sm:$0xff]  ;;  %v2837_v34 = vpack.c.bf16 %v484_v29, %v483_v28  ;;  %v507_v28 = vld [vmem:[%s4577_s1 + $0xf40] sm:$0xff] }
  0xcf   :  { %2816 = vmatpush3.bf16.msra.mxu1 %v2815_v30  ;;  %v515_v30 = vld [vmem:[%s4577_s1 + $0xf80] sm:$0xff] }
  0xd0   :  { %2818 = vmatprep.subr.bf16.mxu1 %v2817_v35  ;;  %v467_v35 = vld [vmem:[%s4577_s1 + $0xe00] sm:$0xff]  ;;  %v2869_v61 = vpack.c.bf16 %v516_v32, %v515_v30  ;;  %v508_v30 = vld [vmem:[%s4577_s1 + $0xf48] sm:$0xff]  ;;  %v493_v32 = vld [vmem:[%s4577_s1 + $0xed0] sm:$0xff] }
  0xd1   :  { %2788 = vmatpush3.bf16.msra.mxu0 %v2787_v41  ;;  %v486_v41 = vld [vmem:[%s4577_s1 + $0xe98] sm:$0xff]  ;;  %v2839_v46 = vpack.c.bf16 %v468_v36, %v467_v35  ;;  %v2887_v36 = vpack.c.bf16 %v508_v30, %v507_v28 }
  0xd2   :  { %2790 = vmatprep.subr.bf16.mxu0 %v2789_v44  ;;  %v517_v44 = vld [vmem:[%s4577_s1 + $0xf90] sm:$0xff]  ;;  %v2841_v50 = vpack.c.bf16 %v486_v41, %v485_v40 }
  0xd3   :  { %2820 = vmatpush3.bf16.msra.mxu1 %v2819_v42  ;;  %v636_v42 = vrot.slane %v4203_v63, %v3141_v39  ;;  %v469_v39 = vld [vmem:[%s4577_s1 + $0xe10] sm:$0xff]  ;;  %v2873_v52 = vpack.c.bf16 %v518_v45, %v517_v44  ;;  %v495_v44 = vld [vmem:[%s4577_s1 + $0xee0] sm:$0xff]  ;;  %v496_v45 = vld [vmem:[%s4577_s1 + $0xee8] sm:$0xff] }
  0xd4   :  { %2822 = vmatprep.subr.bf16.mxu1 %v2821_v49  ;;  %v2871_v49 = vpack.c.bf16 %v500_v38, %v499_v37  ;;  %v2843_v62 = vpack.c.bf16 %v470_v51, %v469_v39  ;;  %v478_v38 = vld [vmem:[%s4577_s1 + $0xe58] sm:$0xff]  ;;  %v509_v40 = vld [vmem:[%s4577_s1 + $0xf50] sm:$0xff]  ;;  %v2861_v39 = vpack.c.bf16 %v496_v45, %v495_v44  ;;  %v479_v51 = vld [vmem:[%s4577_s1 + $0xe60] sm:$0xff] }
  0xd5   :  { %2792 = vmatpush3.bf16.msra.mxu0 %v2791_v55  ;;  %v488_v55 = vld [vmem:[%s4577_s1 + $0xea8] sm:$0xff] }
  0xd6   :  { %2794 = vmatprep.subr.bf16.mxu0 %v2793_v58  ;;  %v519_v58 = vld [vmem:[%s4577_s1 + $0xfa0] sm:$0xff]  ;;  %v2845_v1 = vpack.c.bf16 %v488_v55, %v487_v54  ;;  %v512_v55 = vld [vmem:[%s4577_s1 + $0xf68] sm:$0xff] }
  0xd7   :  { %2824 = vmatpush3.bf16.msra.mxu1 %v2823_v56  ;;  %v656_v56 = vrot.slane %v4203_v63, %v3171_v53  ;;  %v471_v53 = vld [vmem:[%s4577_s1 + $0xe20] sm:$0xff]  ;;  %v2877_v57 = vpack.c.bf16 %v520_v59, %v519_v58  ;;  %v498_v58 = vld [vmem:[%s4577_s1 + $0xef8] sm:$0xff]  ;;  %v532_v59 = vstv %s4579_s2 }
  0xd8   :  { %2826 = vmatprep.subr.bf16.mxu1 %v2825_v0  ;;  %v2875_v0 = vpack.c.bf16 %v502_v43, %v501_v20  ;;  %v2847_v8 = vpack.c.bf16 %v472_v2, %v471_v53  ;;  %v480_v20 = vld [vmem:[%s4577_s1 + $0xe68] sm:$0xff] }
  0xd9   :  { %2796 = vmatpush3.bf16.msra.mxu0 %v2795_v6  ;;  %v490_v6 = vld [vmem:[%s4577_s1 + $0xeb8] sm:$0xff]  ;;  %v2863_v3 = vpack.c.bf16 %v480_v20, %v479_v51 }
  0xda   :  { %2798 = vmatprep.subr.bf16.mxu0 %v2797_v22  ;;  %v522_v22 = vld [vmem:[%s4577_s1 + $0xfb8] sm:$0xff]  ;;  %v2849_v12 = vpack.c.bf16 %v490_v6, %v489_v5  ;;  %v481_v6 = vld [vmem:[%s4577_s1 + $0xe70] sm:$0xff] }
  0xdb   :  { %2828 = vmatpush3.bf16.msra.mxu1 %v2827_v7  ;;  %v521_v7 = vld [vmem:[%s4577_s1 + $0xfb0] sm:$0xff] }
  0xdc   :  { %2830 = vmatprep.subr.bf16.mxu1 %v2829_v13  ;;  %v473_v13 = vld [vmem:[%s4577_s1 + $0xe30] sm:$0xff]  ;;  %v2881_v16 = vpack.c.bf16 %v522_v22, %v521_v7  ;;  %v482_v7 = vld [vmem:[%s4577_s1 + $0xe78] sm:$0xff] }
  0xdd   :  { %2800 = vmatpush3.bf16.msra.mxu0 %v2799_v10  ;;  %v492_v10 = vld [vmem:[%s4577_s1 + $0xec8] sm:$0xff]  ;;  %v2851_v11 = vpack.c.bf16 %v474_v14, %v473_v13  ;;  %v2867_v14 = vpack.c.bf16 %v482_v7, %v481_v6 }
  0xde   :  { %2802 = vmatprep.subr.bf16.mxu0 %v2801_v21  ;;  %v524_v21 = vld [vmem:[%s4577_s1 + $0xfc8] sm:$0xff]  ;;  %v2853_v24 = vpack.c.bf16 %v492_v10, %v491_v18 }
  0xdf   :  { %2832 = vmatpush3.bf16.msra.mxu1 %v2831_v19  ;;  %v523_v19 = vld [vmem:[%s4577_s1 + $0xfc0] sm:$0xff] }
  0xe0   :  { %2834 = vmatprep.subr.bf16.mxu1 %v2833_v25  ;;  %v475_v25 = vld [vmem:[%s4577_s1 + $0xe40] sm:$0xff]  ;;  %v2885_v29 = vpack.c.bf16 %v524_v21, %v523_v19 }
  0xe1   :  { %2804 = vmatpush3.bf16.msra.mxu0 %v2803_v47  ;;  %v494_v47 = vld [vmem:[%s4577_s1 + $0xed8] sm:$0xff]  ;;  %v2855_v35 = vpack.c.bf16 %v476_v26, %v475_v25 }
  0xe2   :  { %2838 = vmatprep.subr.bf16.mxu0 %v2837_v34  ;;  %v526_v34 = vld [vmem:[%s4577_s1 + $0xfd8] sm:$0xff]  ;;  %v2857_v37 = vpack.c.bf16 %v494_v47, %v493_v32 }
  0xe3   :  { %2836 = vmatpush3.bf16.msra.mxu1 %v2835_v33  ;;  %v525_v33 = vld [vmem:[%s4577_s1 + $0xfd0] sm:$0xff] }
  0xe4   :  { %2870 = vmatprep.subr.bf16.mxu1 %v2869_v61  ;;  %1602 = vmatmul.mubr.f32.vlgmr.msra.gmra.mrb[12].mxu0 %v636_v42  ;;  %v477_v61 = vld [vmem:[%s4577_s1 + $0xe50] sm:$0xff]  ;;  %v2889_v41 = vpack.c.bf16 %v526_v34, %v525_v33  ;;  %v510_v42 = vld [vmem:[%s4577_s1 + $0xf58] sm:$0xff] }
  0xe5   :  { %2840 = vmatpush3.bf16.msra.mxu0 %v2839_v46  ;;  %1741 = vmatprep.mubr.f32.mxu0 %v656_v56  ;;  %v527_v46 = vld [vmem:[%s4577_s1 + $0xfe0] sm:$0xff]  ;;  %v497_v56 = vld [vmem:[%s4577_s1 + $0xef0] sm:$0xff] }
  0xe6   :  { %1672 = vmatmul.mubr.f32.vlgmr.msra.gmra.mrb[12].mxu1 %v644_v48  ;;  %2842 = vmatprep.subr.bf16.mxu0 %v2841_v50  ;;  %v528_v48 = vld [vmem:[%s4577_s1 + $0xfe8] sm:$0xff]  ;;  %v2891_v50 = vpack.c.bf16 %v510_v42, %v509_v40  ;;  %v2865_v5 = vpack.c.bf16 %v498_v58, %v497_v56 }
  0xe7   :  { %2872 = vmatpush3.bf16.msra.mxu1 %v2871_v49  ;;  %1811 = vmatprep.mubr.f32.mxu1 %v664_v60  ;;  %v2859_v49 = vpack.c.bf16 %v478_v38, %v477_v61  ;;  %v2893_v54 = vpack.c.bf16 %v528_v48, %v527_v46 }
  0xe8   :  { %2874 = vmatprep.subr.bf16.mxu1 %v2873_v52  ;;  %v511_v52 = vld [vmem:[%s4577_s1 + $0xf60] sm:$0xff] }
  0xe9   :  { %2844 = vmatpush3.bf16.msra.mxu0 %v2843_v62  ;;  %v2895_v4 = vpack.c.bf16 %v512_v55, %v511_v52 }
  0xea   :  { %2846 = vmatprep.subr.bf16.mxu0 %v2845_v1  ;;  %v530_v1 = vld [vmem:[%s4577_s1 + $0xff8] sm:$0xff] }
  0xeb   :  { %2876 = vmatpush3.bf16.msra.mxu1 %v2875_v0  ;;  %v529_v0 = vld [vmem:[%s4577_s1 + $0xff0] sm:$0xff] }
  0xec   :  { %2878 = vmatprep.subr.bf16.mxu1 %v2877_v57 }
  0xed   :  { %2848 = vmatpush3.bf16.msra.mxu0 %v2847_v8  ;;  %v2897_v8 = vpack.c.bf16 %v530_v1, %v529_v0 }
  0xee   :  { %2850 = vmatprep.subr.bf16.mxu0 %v2849_v12  ;;  %v514_v12 = vld [vmem:[%s4577_s1 + $0xf78] sm:$0xff] }
  0xef   :  { %2880 = vmatpush3.bf16.msra.mxu1 %v2879_v9  ;;  %v513_v9 = vld [vmem:[%s4577_s1 + $0xf70] sm:$0xff] }
  0xf0   :  { %2882 = vmatprep.subr.bf16.mxu1 %v2881_v16  ;;  %v2899_v15 = vpack.c.bf16 %v514_v12, %v513_v9  ;;  %v652_v16 = vrot.slane %v4203_v63, %v3353_v27 }
  0xf1   :  { %2852 = vmatpush3.bf16.msra.mxu0 %v2851_v11 }
  0xf2   :  { %2854 = vmatprep.subr.bf16.mxu0 %v2853_v24 }
  0xf3   :  { %2884 = vmatpush3.bf16.msra.mxu1 %v2883_v23 }
  0xf4   :  { %2886 = vmatprep.subr.bf16.mxu1 %v2885_v29 }
  0xf5   :  { %2856 = vmatpush3.bf16.msra.mxu0 %v2855_v35 }
  0xf6   :  { %2858 = vmatprep.subr.bf16.mxu0 %v2857_v37 }
  0xf7   :  { %2888 = vmatpush3.bf16.msra.mxu1 %v2887_v36  ;;  %v1861_v43 = vpop.f32.mrb[0].mxu0 }
  0xf8   :  { %2890 = vmatprep.subr.bf16.mxu1 %v2889_v41  ;;  %v1862_v60 = vpop.f32.mrb[1].mxu0 }
  0xf9   :  { %v1896_v62 = vpop.f32.mrb[0].mxu1  ;;  %v1863_v53 = vadd.f32 %v1862_v60, %v1861_v43  ;;  %2860 = vmatpush3.bf16.msra.mxu0 %v2859_v49 }
  0xfa   :  { %v1897_v2 = vpop.f32.mrb[1].mxu1  ;;  %2862 = vmatprep.subr.bf16.mxu0 %v2861_v39 }
  0xfb   :  { %v1898_v57 = vadd.f32 %v1897_v2, %v1896_v62  ;;  %2892 = vmatpush3.bf16.msra.mxu1 %v2891_v50  ;;  %v764_v22 = vadd.f32 %v1863_v53, %v532_v59 }
  0xfc   :  { %2894 = vmatprep.subr.bf16.mxu1 %v2893_v54 }
  0xfd   :  { %v834_v13 = vadd.f32 %v1898_v57, %v764_v22  ;;  %2864 = vmatpush3.bf16.msra.mxu0 %v2863_v3 }
  0xfe   :  { %2866 = vmatprep.subr.bf16.mxu0 %v2865_v5 }
  0xff   :  { %2896 = vmatpush3.bf16.msra.mxu1 %v2895_v4 }
 0x100   :  { %2898 = vmatprep.subr.bf16.mxu1 %v2897_v8 }
 0x101   :  { %2868 = vmatpush3.bf16.msra.mxu0 %v2867_v14 }
 0x103   :  { %2900 = vmatpush3.bf16.msra.mxu1 %v2899_v15 }
 0x104   :  { %1742 = vmatmul.mubr.f32.vlgmr.msra.gmra.mrb[14].mxu0 %v652_v16 }
 0x106   :  { %1812 = vmatmul.mubr.f32.vlgmr.msra.gmra.mrb[14].mxu1 %v660_v17 }
 0x117   :  { %v1931_v18 = vpop.f32.mrb[2].mxu0 }
 0x118   :  { %v1932_v10 = vpop.f32.mrb[3].mxu0 }
 0x119   :  { %v1966_v19 = vpop.f32.mrb[2].mxu1  ;;  %v1933_v21 = vadd.f32 %v1932_v10, %v1931_v18 }
 0x11a   :  { %v1967_v11 = vpop.f32.mrb[3].mxu1 }
 0x11b   :  { %v1968_v23 = vadd.f32 %v1967_v11, %v1966_v19  ;;  %v904_v24 = vadd.f32 %v1933_v21, %v834_v13 }
 0x11d   :  { %v974_v25 = vadd.f32 %v1968_v23, %v904_v24 }
 0x137   :  { %v2001_v26 = vpop.f32.mrb[4].mxu0 }
 0x138   :  { %v2002_v28 = vpop.f32.mrb[5].mxu0 }
 0x139   :  { %v2036_v29 = vpop.f32.mrb[4].mxu1  ;;  %v2003_v30 = vadd.f32 %v2002_v28, %v2001_v26 }
 0x13a   :  { %v2037_v27 = vpop.f32.mrb[5].mxu1 }
 0x13b   :  { %v2038_v32 = vadd.f32 %v2037_v27, %v2036_v29  ;;  %v1044_v47 = vadd.f32 %v2003_v30, %v974_v25 }
 0x13d   :  { %v1114_v33 = vadd.f32 %v2038_v32, %v1044_v47 }
 0x157   :  { %v2071_v31 = vpop.f32.mrb[6].mxu0 }
 0x158   :  { %v2072_v63 = vpop.f32.mrb[7].mxu0 }
 0x159   :  { %v2106_v34 = vpop.f32.mrb[6].mxu1  ;;  %v2073_v35 = vadd.f32 %v2072_v63, %v2071_v31 }
 0x15a   :  { %v2107_v36 = vpop.f32.mrb[7].mxu1 }
 0x15b   :  { %v2108_v37 = vadd.f32 %v2107_v36, %v2106_v34  ;;  %v1184_v61 = vadd.f32 %v2073_v35, %v1114_v33 }
 0x15d   :  { %v1254_v38 = vadd.f32 %v2108_v37, %v1184_v61 }
 0x177   :  { %v2141_v40 = vpop.f32.mrb[8].mxu0 }
 0x178   :  { %v2142_v41 = vpop.f32.mrb[9].mxu0 }
 0x179   :  { %v2176_v42 = vpop.f32.mrb[8].mxu1  ;;  %v2143_v44 = vadd.f32 %v2142_v41, %v2141_v40 }
 0x17a   :  { %v2177_v45 = vpop.f32.mrb[9].mxu1 }
 0x17b   :  { %v2178_v46 = vadd.f32 %v2177_v45, %v2176_v42  ;;  %v1324_v48 = vadd.f32 %v2143_v44, %v1254_v38 }
 0x17d   :  { %v1394_v49 = vadd.f32 %v2178_v46, %v1324_v48 }
 0x197   :  { %v2211_v50 = vpop.f32.mrb[10].mxu0 }
 0x198   :  { %v2212_v39 = vpop.f32.mrb[11].mxu0 }
 0x199   :  { %v2246_v51 = vpop.f32.mrb[10].mxu1  ;;  %v2213_v20 = vadd.f32 %v2212_v39, %v2211_v50 }
 0x19a   :  { %v2247_v52 = vpop.f32.mrb[11].mxu1 }
 0x19b   :  { %v2248_v43 = vadd.f32 %v2247_v52, %v2246_v51  ;;  %v1464_v54 = vadd.f32 %v2213_v20, %v1394_v49 }
 0x19d   :  { %v1534_v55 = vadd.f32 %v2248_v43, %v1464_v54 }
 0x1b7   :  { %v2281_v56 = vpop.f32.mrb[12].mxu0 }
 0x1b8   :  { %v2282_v58 = vpop.f32.mrb[13].mxu0 }
 0x1b9   :  { %v2316_v59 = vpop.f32.mrb[12].mxu1  ;;  %v2283_v60 = vadd.f32 %v2282_v58, %v2281_v56 }
 0x1ba   :  { %v2317_v62 = vpop.f32.mrb[13].mxu1 }
 0x1bb   :  { %v2318_v0 = vadd.f32 %v2317_v62, %v2316_v59  ;;  %v1604_v1 = vadd.f32 %v2283_v60, %v1534_v55 }
 0x1bd   :  { %v1674_v53 = vadd.f32 %v2318_v0, %v1604_v1 }
 0x1d7   :  { %v2351_v2 = vpop.f32.mrb[14].mxu0 }
 0x1d8   :  { %v2352_v3 = vpop.f32.mrb[15].mxu0 }
 0x1d9   :  { %v2386_v57 = vpop.f32.mrb[14].mxu1  ;;  %v2353_v4 = vadd.f32 %v2352_v3, %v2351_v2 }
 0x1da   :  { %v2387_v5 = vpop.f32.mrb[15].mxu1 }
 0x1db   :  { %v2388_v6 = vadd.f32 %v2387_v5, %v2386_v57  ;;  %v1744_v7 = vadd.f32 %v2353_v4, %v1674_v53 }
 0x1dd   :  { %v1814_v22 = vadd.f32 %v2388_v6, %v1744_v7 }
 0x1df   :  { %v1828_v8 = vmul.f32 -1.442695, %v1814_v22 }
 0x1e1   :  { %2901 = vpow2.f32 %v1828_v8 }
 0x1eb   :  { %v2902_v9 = vpop.eup %2901 }
 0x1ec   :  { %v1820_v12 = vadd.f32 1.0, %v2902_v9 }
 0x1ee   :  { %2903 = vrcp.f32 %v1820_v12 }
 0x1f8   :  { %v2904_v13 = vpop.eup %2903 }
 0x1f9   :  { %1823 = vst [vmem:[%s4580_s3] sm:$0x1] %v2904_v13 }

</bundles_post_ra>
